<compile_context>
chip_gen: v7x
topology: tpu7x:2x2x1
jax: 0.10.0
libtpu: 0.0.40
codegen_flags: <defaults>
</compile_context>

<pallas_src>
import math

import jax
import jax.numpy as jnp
from jax.experimental import pallas as pl
from jax.experimental.pallas import tpu as pltpu

_VMEM_LIMIT = 32 * 1024 * 1024  # explicit scoped-VMEM budget (safe on v5e/v6e/v7x)


# ---------------------------------------------------------------------------
# Kernel 1: fused embedding Linear + GRU input projections (row-tiled matmuls)
# ---------------------------------------------------------------------------
def _embed_proj_kernel(x_ref, wemb_ref, wih_ref, bih_ref, emb_ref, gi_ref):
    e = jnp.dot(x_ref[...], wemb_ref[...], preferred_element_type=jnp.float32)
    emb_ref[...] = e
    gi_ref[...] = (jnp.dot(e, wih_ref[...], preferred_element_type=jnp.float32)
                   + bih_ref[...])


def embed_and_project(x2d, w_emb_t, w_ih_t, b_ih):
    """x2d: (N, Din) time-major rows; returns emb2d (N, E), gi2d (N, 3Ha+3Hb)."""
    n, din = x2d.shape
    e = w_emb_t.shape[1]
    gh = w_ih_t.shape[1]
    rt = n if n <= 256 else 256          # 8x128-friendly row tile, full dim if small
    const = lambda r: (0, 0)
    return pl.pallas_call(
        _embed_proj_kernel,
        out_shape=(jax.ShapeDtypeStruct((n, e), jnp.float32),
                   jax.ShapeDtypeStruct((n, gh), jnp.float32)),
        grid=(pl.cdiv(n, rt),),
        in_specs=[
            pl.BlockSpec((rt, din), lambda r: (r, 0)),
            pl.BlockSpec((din, e), const, pipeline_mode=pl.Buffered(1)),
            pl.BlockSpec((e, gh), const, pipeline_mode=pl.Buffered(1)),
            pl.BlockSpec((1, gh), const, pipeline_mode=pl.Buffered(1)),
        ],
        out_specs=(
            pl.BlockSpec((rt, e), lambda r: (r, 0)),
            pl.BlockSpec((rt, gh), lambda r: (r, 0)),
        ),
        compiler_params=pltpu.CompilerParams(
            dimension_semantics=("parallel",),
            vmem_limit_bytes=_VMEM_LIMIT),
    )(x2d, w_emb_t, w_ih_t, b_ih)


# ---------------------------------------------------------------------------
# Kernel 2: fused dual GRU (alpha + beta recurrences), time-major, h0 = 0
#           Input projections (incl. b_ih) are already folded into gi.
# ---------------------------------------------------------------------------
def _dual_gru_kernel(gi_ref, whh_a_ref, bhh_a_ref, whh_b_ref, bhh_b_ref,
                     g_ref, h_ref, ha_ref, hb_ref):
    t = pl.program_id(0)

    @pl.when(t == 0)
    def _():
        ha_ref[...] = jnp.zeros_like(ha_ref)
        hb_ref[...] = jnp.zeros_like(hb_ref)

    gi = gi_ref[...]                      # (B, 3Ha + 3Hb)
    ha_dim = ha_ref.shape[-1]

    def cell(gi_x, h_prev, whh_t, bhh):
        hdim = h_prev.shape[-1]
        gh = jnp.dot(h_prev, whh_t, preferred_element_type=jnp.float32) + bhh
        i_r, i_z, i_n = gi_x[:, :hdim], gi_x[:, hdim:2 * hdim], gi_x[:, 2 * hdim:]
        h_r, h_z, h_n = gh[:, :hdim], gh[:, hdim:2 * hdim], gh[:, 2 * hdim:]
        r = jax.nn.sigmoid(i_r + h_r)
        z = jax.nn.sigmoid(i_z + h_z)
        n = jnp.tanh(i_n + r * h_n)
        return (1.0 - z) * n + z * h_prev

    ha_new = cell(gi[:, :3 * ha_dim], ha_ref[...], whh_a_ref[...], bhh_a_ref[...])
    hb_new = cell(gi[:, 3 * ha_dim:], hb_ref[...], whh_b_ref[...], bhh_b_ref[...])

    ha_ref[...] = ha_new
    hb_ref[...] = hb_new
    g_ref[...] = ha_new
    h_ref[...] = hb_new


def dual_gru(gi_tb, whh_a_t, bhh_a, whh_b_t, bhh_b):
    """gi_tb: (T, B, 3Ha+3Hb) time-major precomputed input projections."""
    T, B, GH = gi_tb.shape
    Ha = whh_a_t.shape[0]
    Hb = whh_b_t.shape[0]
    const = lambda t: (0, 0)
    return pl.pallas_call(
        _dual_gru_kernel,
        out_shape=(jax.ShapeDtypeStruct((T, B, Ha), jnp.float32),
                   jax.ShapeDtypeStruct((T, B, Hb), jnp.float32)),
        grid=(T,),
        in_specs=[
            pl.BlockSpec((None, B, GH), lambda t: (t, 0, 0)),
            pl.BlockSpec((Ha, 3 * Ha), const, pipeline_mode=pl.Buffered(1)),
            pl.BlockSpec((1, 3 * Ha), const, pipeline_mode=pl.Buffered(1)),
            pl.BlockSpec((Hb, 3 * Hb), const, pipeline_mode=pl.Buffered(1)),
            pl.BlockSpec((1, 3 * Hb), const, pipeline_mode=pl.Buffered(1)),
        ],
        out_specs=(
            pl.BlockSpec((None, B, Ha), lambda t: (t, 0, 0)),
            pl.BlockSpec((None, B, Hb), lambda t: (t, 0, 0)),
        ),
        scratch_shapes=[pltpu.VMEM((B, Ha), jnp.float32),
                        pltpu.VMEM((B, Hb), jnp.float32)],
        compiler_params=pltpu.CompilerParams(
            dimension_semantics=("arbitrary",),     # sequential recurrence
            vmem_limit_bytes=_VMEM_LIMIT),
    )(gi_tb, whh_a_t, bhh_a, whh_b_t, bhh_b)


# ---------------------------------------------------------------------------
# Kernel 3: alpha_fc + stable masked softmax + beta_fc + tanh + context + output
#           Batch-tiled grid; inputs are time-major (T, Bt, .).
# ---------------------------------------------------------------------------
def _attn_kernel(g_ref, h_ref, emb_ref, mask_ref,
                 wa_ref, ba_ref, wb_ref, bb_ref, wo_ref, bo_ref,
                 logit_ref, alpha_ref, beta_ref):
    g = g_ref[...]            # (T, Bt, Ha)
    hh = h_ref[...]           # (T, Bt, Hb)
    emb = emb_ref[...]        # (T, Bt, E)
    mask = mask_ref[...]      # (T, Bt)

    T, Bt, Ha = g.shape
    Hb = hh.shape[-1]
    E = emb.shape[-1]

    # alpha_fc (out_features=1): e[t,b] = g[t,b,:] . wa + ba
    # (VPU multiply + lane reduce; an MXU matvec would need an (N,1)->(T,B)
    #  relayout for no gain at this size.)
    wa_row = wa_ref[...].reshape(1, 1, Ha)                                 # (1,1,Ha)
    e = jnp.sum(g * wa_row, axis=-1) + ba_ref[...]                         # (T, Bt)

    # numerically-stable masked softmax over time (axis 0), EUP reciprocal.
    # (Shift-invariant, hence identical to torch's exp*mask/sum(exp*mask).)
    e_m = jnp.where(mask > 0.0, e, jnp.float32(-1e30))
    m = jnp.max(e_m, axis=0, keepdims=True)                                # (1, Bt)
    p = jnp.exp(e_m - m) * mask                                            # (T, Bt)
    denom = jnp.maximum(jnp.sum(p, axis=0, keepdims=True), jnp.float32(1e-30))
    alpha_tb = p * pl.reciprocal(denom, approx=True)                       # (T, Bt)

    # beta = tanh(beta_fc(h) * mask)   -- one MXU matmul over all (t,b) rows
    bf = (jnp.dot(hh.reshape(T * Bt, Hb), wb_ref[...],
                  preferred_element_type=jnp.float32) + bb_ref[...])       # (T*Bt, E)
    beta_tbe = jnp.tanh(bf.reshape(T, Bt, E) * mask[:, :, None])           # (T, Bt, E)

    # context[b,:] = sum_t alpha[t,b] * beta[t,b,:] * emb[t,b,:]
    # axis 0 is the major (non-sublane, non-lane) dim -> cheap VPU accumulation.
    context = jnp.sum(alpha_tb[:, :, None] * beta_tbe * emb, axis=0)       # (Bt, E)

    # output Linear (Dropout(p=0.2) applied as identity / eval mode)
    logit = (jnp.dot(context, wo_ref[...],
                     preferred_element_type=jnp.float32) + bo_ref[...])    # (Bt, O)

    logit_ref[...] = logit
    alpha_ref[...] = alpha_tb            # time-major (T, Bt)
    beta_ref[...] = beta_tbe             # time-major (T, Bt, E)


def retain_attention(g_tb, h_tb, emb_tb, mask_tb, wa, ba, wb_t, bb, wo_t, bo):
    T, B, Ha = g_tb.shape
    Hb = h_tb.shape[-1]
    E = emb_tb.shape[-1]
    O = wo_t.shape[1]
    bt = B if B <= 128 else 128          # batch tile (full B or 128-row tiles)
    const = lambda b: (0, 0)
    return pl.pallas_call(
        _attn_kernel,
        out_shape=(jax.ShapeDtypeStruct((B, O), jnp.float32),
                   jax.ShapeDtypeStruct((T, B), jnp.float32),
                   jax.ShapeDtypeStruct((T, B, E), jnp.float32)),
        grid=(pl.cdiv(B, bt),),
        in_specs=[
            pl.BlockSpec((T, bt, Ha), lambda b: (0, b, 0)),
            pl.BlockSpec((T, bt, Hb), lambda b: (0, b, 0)),
            pl.BlockSpec((T, bt, E), lambda b: (0, b, 0)),
            pl.BlockSpec((T, bt), lambda b: (0, b)),
            pl.BlockSpec((1, Ha), const, pipeline_mode=pl.Buffered(1)),
            pl.BlockSpec((1, 1), const, pipeline_mode=pl.Buffered(1)),
            pl.BlockSpec((Hb, E), const, pipeline_mode=pl.Buffered(1)),
            pl.BlockSpec((1, E), const, pipeline_mode=pl.Buffered(1)),
            pl.BlockSpec((E, O), const, pipeline_mode=pl.Buffered(1)),
            pl.BlockSpec((1, O), const, pipeline_mode=pl.Buffered(1)),
        ],
        out_specs=(
            pl.BlockSpec((bt, O), lambda b: (b, 0)),
            pl.BlockSpec((T, bt), lambda b: (0, b)),
            pl.BlockSpec((T, bt, E), lambda b: (0, b, 0)),
        ),
        compiler_params=pltpu.CompilerParams(
            dimension_semantics=("parallel",),
            vmem_limit_bytes=_VMEM_LIMIT),
    )(g_tb, h_tb, emb_tb, mask_tb, wa, ba, wb_t, bb, wo_t, bo)


# ---------------------------------------------------------------------------
# Parameter init (matches shapes / init ranges in RETAIN_core.__init__)
# ---------------------------------------------------------------------------
def init_params(key, dim_input, dim_output, dim_emb, dim_alpha, dim_beta):
    ks = jax.random.split(key, 12)

    def u(k, shape, a, b):
        return jax.random.uniform(k, shape, jnp.float32, a, b)

    ka = 1.0 / math.sqrt(dim_alpha)
    kb = 1.0 / math.sqrt(dim_beta)
    return dict(
        w_emb=u(ks[0], (dim_emb, dim_input), -0.5, 0.5),        # torch (out, in)
        w_ih_a=u(ks[1], (3 * dim_alpha, dim_emb), -ka, ka),
        w_hh_a=u(ks[2], (3 * dim_alpha, dim_alpha), -ka, ka),
        b_ih_a=u(ks[3], (3 * dim_alpha,), -ka, ka),
        b_hh_a=u(ks[4], (3 * dim_alpha,), -ka, ka),
        w_ih_b=u(ks[5], (3 * dim_beta, dim_emb), -kb, kb),
        w_hh_b=u(ks[6], (3 * dim_beta, dim_beta), -kb, kb),
        b_ih_b=u(ks[7], (3 * dim_beta,), -kb, kb),
        b_hh_b=u(ks[8], (3 * dim_beta,), -kb, kb),
        w_alpha=u(ks[9], (1, dim_alpha), -0.5, 0.5),
        b_alpha=jnp.zeros((1,), jnp.float32),
        w_beta=u(ks[10], (dim_emb, dim_beta), -0.5, 0.5),
        b_beta=jnp.zeros((dim_emb,), jnp.float32),
        w_out=u(ks[11], (dim_output, dim_emb), -1.0, 1.0),
        b_out=jnp.zeros((dim_output,), jnp.float32),
    )


# ---------------------------------------------------------------------------
# Forward pass
# ---------------------------------------------------------------------------
def retain_forward(params, x, lengths):
    B, T, Din = x.shape
    E = params["w_emb"].shape[0]
    Ha = params["w_hh_a"].shape[1]
    Hb = params["w_hh_b"].shape[1]

    # single up-front transpose of the (small-feature) input to time-major rows;
    # every downstream kernel then reads/writes contiguous (B, .) tiles.
    x_tb = jnp.transpose(x, (1, 0, 2)).reshape(T * B, Din)

    w_emb_t = params["w_emb"].T                                            # (Din, E)
    w_ih_t = jnp.concatenate(
        [params["w_ih_a"].T, params["w_ih_b"].T], axis=1)                  # (E, 3Ha+3Hb)
    b_ih = jnp.concatenate([params["b_ih_a"], params["b_ih_b"]]).reshape(1, -1)

    emb2d, gi2d = embed_and_project(x_tb, w_emb_t, w_ih_t, b_ih)
    emb_tb = emb2d.reshape(T, B, E)
    gi_tb = gi2d.reshape(T, B, 3 * Ha + 3 * Hb)

    # fused alpha/beta recurrences (hidden states run past each length;
    # masked outputs below still match pack_padded_sequence semantics)
    g_tb, h_tb = dual_gru(gi_tb, params["w_hh_a"].T, params["b_hh_a"].reshape(1, -1),
                          params["w_hh_b"].T, params["b_hh_b"].reshape(1, -1))

    # length mask (same as the PyTorch FloatTensor mask), time-major
    mask_tb = (jnp.arange(T)[:, None] < lengths[None, :]).astype(jnp.float32)

    logit, alpha_tb, beta_tb = retain_attention(
        g_tb, h_tb, emb_tb, mask_tb,
        params["w_alpha"], params["b_alpha"].reshape(1, 1),
        params["w_beta"].T, params["b_beta"].reshape(1, -1),
        params["w_out"].T, params["b_out"].reshape(1, -1))

    alpha = jnp.transpose(alpha_tb)[:, :, None]   # (B, T, 1) torch layout
    beta = jnp.transpose(beta_tb, (1, 0, 2))      # (B, T, E) torch layout

    att_dict = {
        "w_out": params["w_out"],
        "w_emb": params["w_emb"],
        "alpha": alpha,                           # (B, T, 1)
        "beta": beta,                             # (B, T, dim_emb)
    }
    return logit, att_dict


if __name__ == "__main__":
    B, T = 8, 8
    dim_input, dim_output = 16, 4
    # lane-aligned hidden sizes (multiples of 128)
    dim_emb = dim_alpha = dim_beta = 128

    key = jax.random.PRNGKey(0)
    k_param, k_x = jax.random.split(key)
    params = init_params(k_param, dim_input, dim_output, dim_emb, dim_alpha, dim_beta)

    x = jax.random.normal(k_x, (B, T, dim_input), dtype=jnp.float32)
    lengths = jnp.array([8, 7, 6, 5, 4, 4, 2, 1], dtype=jnp.int32)  # sorted descending

    fwd = jax.jit(retain_forward)
    logit, att = fwd(params, x, lengths)
    jax.block_until_ready((logit, att))

    assert logit.shape == (B, dim_output)
    assert att["alpha"].shape == (B, T, 1)
    assert att["beta"].shape == (B, T, dim_emb)
    assert bool(jnp.all(jnp.isfinite(logit)))

    # masked positions must carry exactly zero attention / beta
    mask_bt = (jnp.arange(T)[None, :] < lengths[:, None]).astype(jnp.float32)
    assert bool(jnp.all(jnp.where(mask_bt == 0.0, att["alpha"][:, :, 0], 0.0) == 0.0))
    assert bool(jnp.all(jnp.where(mask_bt[:, :, None] == 0.0, att["beta"], 0.0) == 0.0))
    # masked softmax: alpha sums to ~1 per sequence (approx-reciprocal tolerance)
    assert bool(jnp.allclose(jnp.sum(att["alpha"][:, :, 0], axis=1), 1.0, atol=1e-2))
    print("KERNEL_OK")
</pallas_src>

<mosaic_0001>
module attributes {stable_mosaic.version = 11 : i64} {
  func.func @_embed_proj_kernel(%arg0: i32, %arg1: memref<64x16xf32, #tpu.memory_space<vmem>>, %arg2: memref<16x128xf32, #tpu.memory_space<vmem>>, %arg3: memref<128x768xf32, #tpu.memory_space<vmem>>, %arg4: memref<1x768xf32, #tpu.memory_space<vmem>>, %arg5: memref<64x128xf32, #tpu.memory_space<vmem>>, %arg6: memref<64x768xf32, #tpu.memory_space<vmem>>) attributes {dimension_semantics = [#tpu.dimension_semantics<parallel>], iteration_bounds = array<i64: 1>, scalar_prefetch = 0 : i64, scratch_operands = 0 : i64, tpu.core_type = #tpu.core_type<tc>, window_params = [{transform_indices = @transform_0, window_bounds = array<i64: 64, 16>}, {pipeline_mode = #tpu.pipeline_mode<synchronous>, transform_indices = @transform_1, window_bounds = array<i64: 16, 128>}, {pipeline_mode = #tpu.pipeline_mode<synchronous>, transform_indices = @transform_2, window_bounds = array<i64: 128, 768>}, {pipeline_mode = #tpu.pipeline_mode<synchronous>, transform_indices = @transform_3, window_bounds = array<i64: 1, 768>}, {transform_indices = @transform_4, window_bounds = array<i64: 64, 128>}, {transform_indices = @transform_5, window_bounds = array<i64: 64, 768>}]} {
    %c0 = arith.constant 0 : index
    %c0_0 = arith.constant 0 : index
    %0 = vector.load %arg1[%c0, %c0_0] : memref<64x16xf32, #tpu.memory_space<vmem>>, vector<64x16xf32>
    %c0_1 = arith.constant 0 : index
    %c0_2 = arith.constant 0 : index
    %1 = vector.load %arg2[%c0_1, %c0_2] : memref<16x128xf32, #tpu.memory_space<vmem>>, vector<16x128xf32>
    %cst = arith.constant dense<0.000000e+00> : vector<64x128xf32>
    %2 = tpu.matmul %0, %1, %cst {dimension_numbers = #tpu.dot_dimension_numbers<[1], [0], [0], [1], [0, 0, 1, 1], [], []>} : vector<64x16xf32>, vector<16x128xf32>, vector<64x128xf32> -> vector<64x128xf32>
    %c0_3 = arith.constant 0 : index
    %c0_4 = arith.constant 0 : index
    %3 = vector.load %arg5[%c0_3, %c0_4] : memref<64x128xf32, #tpu.memory_space<vmem>>, vector<64x128xf32>
    tpu.vector_store %arg5[%c0_3, %c0_4], %2 {strides = array<i32>} : memref<64x128xf32, #tpu.memory_space<vmem>>, vector<64x128xf32>,
    %c0_5 = arith.constant 0 : index
    %c0_6 = arith.constant 0 : index
    %4 = vector.load %arg3[%c0_5, %c0_6] : memref<128x768xf32, #tpu.memory_space<vmem>>, vector<128x768xf32>
    %cst_7 = arith.constant dense<0.000000e+00> : vector<64x768xf32>
    %5 = tpu.matmul %2, %4, %cst_7 {dimension_numbers = #tpu.dot_dimension_numbers<[1], [0], [0], [1], [0, 0, 1, 1], [], []>} : vector<64x128xf32>, vector<128x768xf32>, vector<64x768xf32> -> vector<64x768xf32>
    %c0_8 = arith.constant 0 : index
    %c0_9 = arith.constant 0 : index
    %6 = vector.load %arg4[%c0_8, %c0_9] : memref<1x768xf32, #tpu.memory_space<vmem>>, vector<1x768xf32>
    %7 = vector.broadcast %6 : vector<1x768xf32> to vector<64x768xf32>
    %8 = arith.addf %5, %7 : vector<64x768xf32>
    %c0_10 = arith.constant 0 : index
    %c0_11 = arith.constant 0 : index
    %9 = vector.load %arg6[%c0_10, %c0_11] : memref<64x768xf32, #tpu.memory_space<vmem>>, vector<64x768xf32>
    tpu.vector_store %arg6[%c0_10, %c0_11], %8 {strides = array<i32>} : memref<64x768xf32, #tpu.memory_space<vmem>>, vector<64x768xf32>,
    return
  }
  func.func @transform_0(%arg0: i32) -> (i32, i32) {
    %c0_i32 = arith.constant 0 : i32
    %c0_i32_0 = arith.constant 0 : i32
    return %arg0, %c0_i32 : i32, i32
  }
  func.func @transform_1(%arg0: i32) -> (i32, i32) {
    %c0_i32 = arith.constant 0 : i32
    %c0_i32_0 = arith.constant 0 : i32
    %c0_i32_1 = arith.constant 0 : i32
    return %c0_i32, %c0_i32_0 : i32, i32
  }
  func.func @transform_2(%arg0: i32) -> (i32, i32) {
    %c0_i32 = arith.constant 0 : i32
    %c0_i32_0 = arith.constant 0 : i32
    %c0_i32_1 = arith.constant 0 : i32
    return %c0_i32, %c0_i32_0 : i32, i32
  }
  func.func @transform_3(%arg0: i32) -> (i32, i32) {
    %c0_i32 = arith.constant 0 : i32
    %c0_i32_0 = arith.constant 0 : i32
    %c0_i32_1 = arith.constant 0 : i32
    return %c0_i32, %c0_i32_0 : i32, i32
  }
  func.func @transform_4(%arg0: i32) -> (i32, i32) {
    %c0_i32 = arith.constant 0 : i32
    %c0_i32_0 = arith.constant 0 : i32
    return %arg0, %c0_i32 : i32, i32
  }
  func.func @transform_5(%arg0: i32) -> (i32, i32) {
    %c0_i32 = arith.constant 0 : i32
    %c0_i32_0 = arith.constant 0 : i32
    return %arg0, %c0_i32 : i32, i32
  }
}

module attributes {stable_mosaic.version = 11 : i64} {
  func.func @_attn_kernel(%arg0: i32, %arg1: memref<8x8x128xf32, #tpu.memory_space<vmem>>, %arg2: memref<8x8x128xf32, #tpu.memory_space<vmem>>, %arg3: memref<8x8x128xf32, #tpu.memory_space<vmem>>, %arg4: memref<8x8xf32, #tpu.memory_space<vmem>>, %arg5: memref<1x128xf32, #tpu.memory_space<vmem>>, %arg6: memref<1x1xf32, #tpu.memory_space<vmem>>, %arg7: memref<128x128xf32, #tpu.memory_space<vmem>>, %arg8: memref<1x128xf32, #tpu.memory_space<vmem>>, %arg9: memref<128x4xf32, #tpu.memory_space<vmem>>, %arg10: memref<1x4xf32, #tpu.memory_space<vmem>>, %arg11: memref<8x4xf32, #tpu.memory_space<vmem>>, %arg12: memref<8x8xf32, #tpu.memory_space<vmem>>, %arg13: memref<8x8x128xf32, #tpu.memory_space<vmem>>) attributes {dimension_semantics = [#tpu.dimension_semantics<parallel>], iteration_bounds = array<i64: 1>, scalar_prefetch = 0 : i64, scratch_operands = 0 : i64, tpu.core_type = #tpu.core_type<tc>, window_params = [{transform_indices = @transform_0, window_bounds = array<i64: 8, 8, 128>}, {transform_indices = @transform_1, window_bounds = array<i64: 8, 8, 128>}, {transform_indices = @transform_2, window_bounds = array<i64: 8, 8, 128>}, {transform_indices = @transform_3, window_bounds = array<i64: 8, 8>}, {pipeline_mode = #tpu.pipeline_mode<synchronous>, transform_indices = @transform_4, window_bounds = array<i64: 1, 128>}, {pipeline_mode = #tpu.pipeline_mode<synchronous>, transform_indices = @transform_5, window_bounds = array<i64: 1, 1>}, {pipeline_mode = #tpu.pipeline_mode<synchronous>, transform_indices = @transform_6, window_bounds = array<i64: 128, 128>}, {pipeline_mode = #tpu.pipeline_mode<synchronous>, transform_indices = @transform_7, window_bounds = array<i64: 1, 128>}, {pipeline_mode = #tpu.pipeline_mode<synchronous>, transform_indices = @transform_8, window_bounds = array<i64: 128, 4>}, {pipeline_mode = #tpu.pipeline_mode<synchronous>, transform_indices = @transform_9, window_bounds = array<i64: 1, 4>}, {transform_indices = @transform_10, window_bounds = array<i64: 8, 4>}, {transform_indices = @transform_11, window_bounds = array<i64: 8, 8>}, {transform_indices = @transform_12, window_bounds = array<i64: 8, 8, 128>}]} {
    %c0 = arith.constant 0 : index
    %c0_0 = arith.constant 0 : index
    %c0_1 = arith.constant 0 : index
    %0 = vector.load %arg1[%c0, %c0_0, %c0_1] : memref<8x8x128xf32, #tpu.memory_space<vmem>>, vector<8x8x128xf32>
    %c0_2 = arith.constant 0 : index
    %c0_3 = arith.constant 0 : index
    %c0_4 = arith.constant 0 : index
    %1 = vector.load %arg2[%c0_2, %c0_3, %c0_4] : memref<8x8x128xf32, #tpu.memory_space<vmem>>, vector<8x8x128xf32>
    %c0_5 = arith.constant 0 : index
    %c0_6 = arith.constant 0 : index
    %c0_7 = arith.constant 0 : index
    %2 = vector.load %arg3[%c0_5, %c0_6, %c0_7] : memref<8x8x128xf32, #tpu.memory_space<vmem>>, vector<8x8x128xf32>
    %c0_8 = arith.constant 0 : index
    %c0_9 = arith.constant 0 : index
    %3 = vector.load %arg4[%c0_8, %c0_9] : memref<8x8xf32, #tpu.memory_space<vmem>>, vector<8x8xf32>
    %c0_10 = arith.constant 0 : index
    %c0_11 = arith.constant 0 : index
    %4 = vector.load %arg5[%c0_10, %c0_11] : memref<1x128xf32, #tpu.memory_space<vmem>>, vector<1x128xf32>
    %5 = vector.shape_cast %4 : vector<1x128xf32> to vector<1x1x128xf32>
    %6 = vector.broadcast %5 : vector<1x1x128xf32> to vector<8x8x128xf32>
    %7 = arith.mulf %0, %6 : vector<8x8x128xf32>
    %cst = arith.constant dense<0.000000e+00> : vector<8x8xf32>
    %8 = vector.multi_reduction <add>, %7, %cst [2] : vector<8x8x128xf32> to vector<8x8xf32>
    %c0_12 = arith.constant 0 : index
    %c0_13 = arith.constant 0 : index
    %9 = vector.load %arg6[%c0_12, %c0_13] : memref<1x1xf32, #tpu.memory_space<vmem>>, vector<1x1xf32>
    %10 = vector.broadcast %9 : vector<1x1xf32> to vector<8x8xf32>
    %11 = arith.addf %8, %10 : vector<8x8xf32>
    %cst_14 = arith.constant 0.000000e+00 : f32
    %12 = vector.broadcast %cst_14 : f32 to vector<8x8xf32>
    %13 = arith.cmpf ogt, %3, %12 : vector<8x8xf32>
    %cst_15 = arith.constant -1.000000e+30 : f32
    %14 = vector.broadcast %cst_15 : f32 to vector<8x8xf32>
    %15 = arith.select %13, %11, %14 : vector<8x8xi1>, vector<8x8xf32>
    %cst_16 = arith.constant dense<0xFF800000> : vector<8xf32>
    %16 = vector.multi_reduction <maximumf>, %15, %cst_16 [0] : vector<8x8xf32> to vector<8xf32>
    %17 = vector.shape_cast %16 : vector<8xf32> to vector<1x8xf32>
    %18 = vector.broadcast %17 : vector<1x8xf32> to vector<8x8xf32>
    %19 = arith.subf %15, %18 : vector<8x8xf32>
    %20 = math.exp %19 : vector<8x8xf32>
    %21 = arith.mulf %20, %3 : vector<8x8xf32>
    %cst_17 = arith.constant dense<0.000000e+00> : vector<8xf32>
    %22 = vector.multi_reduction <add>, %21, %cst_17 [0] : vector<8x8xf32> to vector<8xf32>
    %23 = vector.shape_cast %22 : vector<8xf32> to vector<1x8xf32>
    %cst_18 = arith.constant 1.000000e-30 : f32
    %24 = vector.broadcast %cst_18 : f32 to vector<1x8xf32>
    %25 = arith.maximumf %23, %24 : vector<1x8xf32>
    %26 = tpu.reciprocal %25 {approx = true} : vector<1x8xf32> -> vector<1x8xf32>
    %27 = vector.broadcast %26 : vector<1x8xf32> to vector<8x8xf32>
    %28 = arith.mulf %21, %27 : vector<8x8xf32>
    %29 = vector.shape_cast %1 : vector<8x8x128xf32> to vector<64x128xf32>
    %c0_19 = arith.constant 0 : index
    %c0_20 = arith.constant 0 : index
    %30 = vector.load %arg7[%c0_19, %c0_20] : memref<128x128xf32, #tpu.memory_space<vmem>>, vector<128x128xf32>
    %cst_21 = arith.constant dense<0.000000e+00> : vector<64x128xf32>
    %31 = tpu.matmul %29, %30, %cst_21 {dimension_numbers = #tpu.dot_dimension_numbers<[1], [0], [0], [1], [0, 0, 1, 1], [], []>} : vector<64x128xf32>, vector<128x128xf32>, vector<64x128xf32> -> vector<64x128xf32>
    %c0_22 = arith.constant 0 : index
    %c0_23 = arith.constant 0 : index
    %32 = vector.load %arg8[%c0_22, %c0_23] : memref<1x128xf32, #tpu.memory_space<vmem>>, vector<1x128xf32>
    %33 = vector.broadcast %32 : vector<1x128xf32> to vector<64x128xf32>
    %34 = arith.addf %31, %33 : vector<64x128xf32>
    %35 = vector.shape_cast %34 : vector<64x128xf32> to vector<8x8x128xf32>
    %36 = vector.shape_cast %3 : vector<8x8xf32> to vector<8x8x1xf32>
    %37 = vector.broadcast %36 : vector<8x8x1xf32> to vector<8x8x128xf32>
    %38 = arith.mulf %35, %37 : vector<8x8x128xf32>
    %39 = math.tanh %38 : vector<8x8x128xf32>
    %40 = vector.shape_cast %28 : vector<8x8xf32> to vector<8x8x1xf32>
    %41 = vector.broadcast %40 : vector<8x8x1xf32> to vector<8x8x128xf32>
    %42 = arith.mulf %41, %39 : vector<8x8x128xf32>
    %43 = arith.mulf %42, %2 : vector<8x8x128xf32>
    %cst_24 = arith.constant dense<0.000000e+00> : vector<8x128xf32>
    %44 = vector.multi_reduction <add>, %43, %cst_24 [0] : vector<8x8x128xf32> to vector<8x128xf32>
    %c0_25 = arith.constant 0 : index
    %c0_26 = arith.constant 0 : index
    %45 = vector.load %arg9[%c0_25, %c0_26] : memref<128x4xf32, #tpu.memory_space<vmem>>, vector<128x4xf32>
    %cst_27 = arith.constant dense<0.000000e+00> : vector<8x4xf32>
    %46 = tpu.matmul %44, %45, %cst_27 {dimension_numbers = #tpu.dot_dimension_numbers<[1], [0], [0], [1], [0, 0, 1, 1], [], []>} : vector<8x128xf32>, vector<128x4xf32>, vector<8x4xf32> -> vector<8x4xf32>
    %c0_28 = arith.constant 0 : index
    %c0_29 = arith.constant 0 : index
    %47 = vector.load %arg10[%c0_28, %c0_29] : memref<1x4xf32, #tpu.memory_space<vmem>>, vector<1x4xf32>
    %48 = vector.broadcast %47 : vector<1x4xf32> to vector<8x4xf32>
    %49 = arith.addf %46, %48 : vector<8x4xf32>
    %c0_30 = arith.constant 0 : index
    %c0_31 = arith.constant 0 : index
    %50 = vector.load %arg11[%c0_30, %c0_31] : memref<8x4xf32, #tpu.memory_space<vmem>>, vector<8x4xf32>
    tpu.vector_store %arg11[%c0_30, %c0_31], %49 {strides = array<i32>} : memref<8x4xf32, #tpu.memory_space<vmem>>, vector<8x4xf32>,
    %c0_32 = arith.constant 0 : index
    %c0_33 = arith.constant 0 : index
    %51 = vector.load %arg12[%c0_32, %c0_33] : memref<8x8xf32, #tpu.memory_space<vmem>>, vector<8x8xf32>
    tpu.vector_store %arg12[%c0_32, %c0_33], %28 {strides = array<i32>} : memref<8x8xf32, #tpu.memory_space<vmem>>, vector<8x8xf32>,
    %c0_34 = arith.constant 0 : index
    %c0_35 = arith.constant 0 : index
    %c0_36 = arith.constant 0 : index
    %52 = vector.load %arg13[%c0_34, %c0_35, %c0_36] : memref<8x8x128xf32, #tpu.memory_space<vmem>>, vector<8x8x128xf32>
    tpu.vector_store %arg13[%c0_34, %c0_35, %c0_36], %39 {strides = array<i32>} : memref<8x8x128xf32, #tpu.memory_space<vmem>>, vector<8x8x128xf32>,
    return
  }
  func.func @transform_0(%arg0: i32) -> (i32, i32, i32) {
    %c0_i32 = arith.constant 0 : i32
    %c0_i32_0 = arith.constant 0 : i32
    %c0_i32_1 = arith.constant 0 : i32
    return %c0_i32, %arg0, %c0_i32_0 : i32, i32, i32
  }
  func.func @transform_1(%arg0: i32) -> (i32, i32, i32) {
    %c0_i32 = arith.constant 0 : i32
    %c0_i32_0 = arith.constant 0 : i32
    %c0_i32_1 = arith.constant 0 : i32
    return %c0_i32, %arg0, %c0_i32_0 : i32, i32, i32
  }
  func.func @transform_2(%arg0: i32) -> (i32, i32, i32) {
    %c0_i32 = arith.constant 0 : i32
    %c0_i32_0 = arith.constant 0 : i32
    %c0_i32_1 = arith.constant 0 : i32
    return %c0_i32, %arg0, %c0_i32_0 : i32, i32, i32
  }
  func.func @transform_3(%arg0: i32) -> (i32, i32) {
    %c0_i32 = arith.constant 0 : i32
    %c0_i32_0 = arith.constant 0 : i32
    return %c0_i32, %arg0 : i32, i32
  }
  func.func @transform_4(%arg0: i32) -> (i32, i32) {
    %c0_i32 = arith.constant 0 : i32
    %c0_i32_0 = arith.constant 0 : i32
    %c0_i32_1 = arith.constant 0 : i32
    return %c0_i32, %c0_i32_0 : i32, i32
  }
  func.func @transform_5(%arg0: i32) -> (i32, i32) {
    %c0_i32 = arith.constant 0 : i32
    %c0_i32_0 = arith.constant 0 : i32
    %c0_i32_1 = arith.constant 0 : i32
    return %c0_i32, %c0_i32_0 : i32, i32
  }
  func.func @transform_6(%arg0: i32) -> (i32, i32) {
    %c0_i32 = arith.constant 0 : i32
    %c0_i32_0 = arith.constant 0 : i32
    %c0_i32_1 = arith.constant 0 : i32
    return %c0_i32, %c0_i32_0 : i32, i32
  }
  func.func @transform_7(%arg0: i32) -> (i32, i32) {
    %c0_i32 = arith.constant 0 : i32
    %c0_i32_0 = arith.constant 0 : i32
    %c0_i32_1 = arith.constant 0 : i32
    return %c0_i32, %c0_i32_0 : i32, i32
  }
  func.func @transform_8(%arg0: i32) -> (i32, i32) {
    %c0_i32 = arith.constant 0 : i32
    %c0_i32_0 = arith.constant 0 : i32
    %c0_i32_1 = arith.constant 0 : i32
    return %c0_i32, %c0_i32_0 : i32, i32
  }
  func.func @transform_9(%arg0: i32) -> (i32, i32) {
    %c0_i32 = arith.constant 0 : i32
    %c0_i32_0 = arith.constant 0 : i32
    %c0_i32_1 = arith.constant 0 : i32
    return %c0_i32, %c0_i32_0 : i32, i32
  }
  func.func @transform_10(%arg0: i32) -> (i32, i32) {
    %c0_i32 = arith.constant 0 : i32
    %c0_i32_0 = arith.constant 0 : i32
    return %arg0, %c0_i32 : i32, i32
  }
  func.func @transform_11(%arg0: i32) -> (i32, i32) {
    %c0_i32 = arith.constant 0 : i32
    %c0_i32_0 = arith.constant 0 : i32
    return %c0_i32, %arg0 : i32, i32
  }
  func.func @transform_12(%arg0: i32) -> (i32, i32, i32) {
    %c0_i32 = arith.constant 0 : i32
    %c0_i32_0 = arith.constant 0 : i32
    %c0_i32_1 = arith.constant 0 : i32
    return %c0_i32, %arg0, %c0_i32_0 : i32, i32, i32
  }
}

module attributes {stable_mosaic.version = 11 : i64} {
  func.func @_dual_gru_kernel(%arg0: i32, %arg1: memref<1x8x768xf32, #tpu.memory_space<vmem>>, %arg2: memref<128x384xf32, #tpu.memory_space<vmem>>, %arg3: memref<1x384xf32, #tpu.memory_space<vmem>>, %arg4: memref<128x384xf32, #tpu.memory_space<vmem>>, %arg5: memref<1x384xf32, #tpu.memory_space<vmem>>, %arg6: memref<1x8x128xf32, #tpu.memory_space<vmem>>, %arg7: memref<1x8x128xf32, #tpu.memory_space<vmem>>, %arg8: memref<8x128xf32, #tpu.memory_space<vmem>>, %arg9: memref<8x128xf32, #tpu.memory_space<vmem>>) attributes {dimension_semantics = [#tpu.dimension_semantics<arbitrary>], iteration_bounds = array<i64: 8>, scalar_prefetch = 0 : i64, scratch_operands = 2 : i64, tpu.core_type = #tpu.core_type<tc>, window_params = [{transform_indices = @transform_0, window_bounds = array<i64: 1, 8, 768>}, {pipeline_mode = #tpu.pipeline_mode<synchronous>, transform_indices = @transform_1, window_bounds = array<i64: 128, 384>}, {pipeline_mode = #tpu.pipeline_mode<synchronous>, transform_indices = @transform_2, window_bounds = array<i64: 1, 384>}, {pipeline_mode = #tpu.pipeline_mode<synchronous>, transform_indices = @transform_3, window_bounds = array<i64: 128, 384>}, {pipeline_mode = #tpu.pipeline_mode<synchronous>, transform_indices = @transform_4, window_bounds = array<i64: 1, 384>}, {transform_indices = @transform_5, window_bounds = array<i64: 1, 8, 128>}, {transform_indices = @transform_6, window_bounds = array<i64: 1, 8, 128>}]} {
    %c0_i32 = arith.constant 0 : i32
    %0 = arith.cmpi eq, %arg0, %c0_i32 : i32
    %1 = arith.extui %0 : i1 to i32
    %c0_i32_0 = arith.constant 0 : i32
    %2 = arith.cmpi ne, %1, %c0_i32_0 : i32
    scf.if %2 {
      %cst_32 = arith.constant 0.000000e+00 : f32
      %79 = vector.broadcast %cst_32 : f32 to vector<8x128xf32>
      %c0_33 = arith.constant 0 : index
      %c0_34 = arith.constant 0 : index
      %80 = vector.load %arg8[%c0_33, %c0_34] : memref<8x128xf32, #tpu.memory_space<vmem>>, vector<8x128xf32>
      tpu.vector_store %arg8[%c0_33, %c0_34], %79 {strides = array<i32>} : memref<8x128xf32, #tpu.memory_space<vmem>>, vector<8x128xf32>,
      %cst_35 = arith.constant 0.000000e+00 : f32
      %81 = vector.broadcast %cst_35 : f32 to vector<8x128xf32>
      %c0_36 = arith.constant 0 : index
      %c0_37 = arith.constant 0 : index
      %82 = vector.load %arg9[%c0_36, %c0_37] : memref<8x128xf32, #tpu.memory_space<vmem>>, vector<8x128xf32>
      tpu.vector_store %arg9[%c0_36, %c0_37], %81 {strides = array<i32>} : memref<8x128xf32, #tpu.memory_space<vmem>>, vector<8x128xf32>,
    } else {
    }
    %c0 = arith.constant 0 : index
    %c0_1 = arith.constant 0 : index
    %c0_2 = arith.constant 0 : index
    %3 = vector.load %arg1[%c0, %c0_1, %c0_2] : memref<1x8x768xf32, #tpu.memory_space<vmem>>, vector<1x8x768xf32>
    %4 = vector.shape_cast %3 : vector<1x8x768xf32> to vector<8x768xf32>
    %5 = vector.extract_strided_slice %4 {offsets = [0, 0], sizes = [8, 384], strides = [1, 1]} : vector<8x768xf32> to vector<8x384xf32>
    %c0_3 = arith.constant 0 : index
    %c0_4 = arith.constant 0 : index
    %6 = vector.load %arg8[%c0_3, %c0_4] : memref<8x128xf32, #tpu.memory_space<vmem>>, vector<8x128xf32>
    %c0_5 = arith.constant 0 : index
    %c0_6 = arith.constant 0 : index
    %7 = vector.load %arg2[%c0_5, %c0_6] : memref<128x384xf32, #tpu.memory_space<vmem>>, vector<128x384xf32>
    %c0_7 = arith.constant 0 : index
    %c0_8 = arith.constant 0 : index
    %8 = vector.load %arg3[%c0_7, %c0_8] : memref<1x384xf32, #tpu.memory_space<vmem>>, vector<1x384xf32>
    %cst = arith.constant dense<0.000000e+00> : vector<8x384xf32>
    %9 = tpu.matmul %6, %7, %cst {dimension_numbers = #tpu.dot_dimension_numbers<[1], [0], [0], [1], [0, 0, 1, 1], [], []>} : vector<8x128xf32>, vector<128x384xf32>, vector<8x384xf32> -> vector<8x384xf32>
    %10 = vector.broadcast %8 : vector<1x384xf32> to vector<8x384xf32>
    %11 = arith.addf %9, %10 : vector<8x384xf32>
    %12 = vector.extract_strided_slice %5 {offsets = [0, 0], sizes = [8, 128], strides = [1, 1]} : vector<8x384xf32> to vector<8x128xf32>
    %13 = vector.extract_strided_slice %5 {offsets = [0, 128], sizes = [8, 128], strides = [1, 1]} : vector<8x384xf32> to vector<8x128xf32>
    %14 = vector.extract_strided_slice %5 {offsets = [0, 256], sizes = [8, 128], strides = [1, 1]} : vector<8x384xf32> to vector<8x128xf32>
    %15 = vector.extract_strided_slice %11 {offsets = [0, 0], sizes = [8, 128], strides = [1, 1]} : vector<8x384xf32> to vector<8x128xf32>
    %16 = vector.extract_strided_slice %11 {offsets = [0, 128], sizes = [8, 128], strides = [1, 1]} : vector<8x384xf32> to vector<8x128xf32>
    %17 = vector.extract_strided_slice %11 {offsets = [0, 256], sizes = [8, 128], strides = [1, 1]} : vector<8x384xf32> to vector<8x128xf32>
    %18 = arith.addf %12, %15 : vector<8x128xf32>
    %19 = arith.negf %18 : vector<8x128xf32>
    %20 = math.exp %19 : vector<8x128xf32>
    %cst_9 = arith.constant 1.000000e+00 : f32
    %21 = vector.broadcast %cst_9 : f32 to vector<8x128xf32>
    %22 = arith.addf %21, %20 : vector<8x128xf32>
    %23 = arith.divf %21, %22 : vector<8x128xf32>
    %24 = arith.addf %13, %16 : vector<8x128xf32>
    %25 = arith.negf %24 : vector<8x128xf32>
    %26 = math.exp %25 : vector<8x128xf32>
    %cst_10 = arith.constant 1.000000e+00 : f32
    %27 = vector.broadcast %cst_10 : f32 to vector<8x128xf32>
    %28 = arith.addf %27, %26 : vector<8x128xf32>
    %29 = arith.divf %27, %28 : vector<8x128xf32>
    %30 = arith.mulf %23, %17 : vector<8x128xf32>
    %31 = arith.addf %14, %30 : vector<8x128xf32>
    %32 = math.tanh %31 : vector<8x128xf32>
    %cst_11 = arith.constant 1.000000e+00 : f32
    %33 = vector.broadcast %cst_11 : f32 to vector<8x128xf32>
    %34 = arith.subf %33, %29 : vector<8x128xf32>
    %35 = arith.mulf %34, %32 : vector<8x128xf32>
    %36 = arith.mulf %29, %6 : vector<8x128xf32>
    %37 = arith.addf %35, %36 : vector<8x128xf32>
    %38 = vector.extract_strided_slice %4 {offsets = [0, 384], sizes = [8, 384], strides = [1, 1]} : vector<8x768xf32> to vector<8x384xf32>
    %c0_12 = arith.constant 0 : index
    %c0_13 = arith.constant 0 : index
    %39 = vector.load %arg9[%c0_12, %c0_13] : memref<8x128xf32, #tpu.memory_space<vmem>>, vector<8x128xf32>
    %c0_14 = arith.constant 0 : index
    %c0_15 = arith.constant 0 : index
    %40 = vector.load %arg4[%c0_14, %c0_15] : memref<128x384xf32, #tpu.memory_space<vmem>>, vector<128x384xf32>
    %c0_16 = arith.constant 0 : index
    %c0_17 = arith.constant 0 : index
    %41 = vector.load %arg5[%c0_16, %c0_17] : memref<1x384xf32, #tpu.memory_space<vmem>>, vector<1x384xf32>
    %cst_18 = arith.constant dense<0.000000e+00> : vector<8x384xf32>
    %42 = tpu.matmul %39, %40, %cst_18 {dimension_numbers = #tpu.dot_dimension_numbers<[1], [0], [0], [1], [0, 0, 1, 1], [], []>} : vector<8x128xf32>, vector<128x384xf32>, vector<8x384xf32> -> vector<8x384xf32>
    %43 = vector.broadcast %41 : vector<1x384xf32> to vector<8x384xf32>
    %44 = arith.addf %42, %43 : vector<8x384xf32>
    %45 = vector.extract_strided_slice %38 {offsets = [0, 0], sizes = [8, 128], strides = [1, 1]} : vector<8x384xf32> to vector<8x128xf32>
    %46 = vector.extract_strided_slice %38 {offsets = [0, 128], sizes = [8, 128], strides = [1, 1]} : vector<8x384xf32> to vector<8x128xf32>
    %47 = vector.extract_strided_slice %38 {offsets = [0, 256], sizes = [8, 128], strides = [1, 1]} : vector<8x384xf32> to vector<8x128xf32>
    %48 = vector.extract_strided_slice %44 {offsets = [0, 0], sizes = [8, 128], strides = [1, 1]} : vector<8x384xf32> to vector<8x128xf32>
    %49 = vector.extract_strided_slice %44 {offsets = [0, 128], sizes = [8, 128], strides = [1, 1]} : vector<8x384xf32> to vector<8x128xf32>
    %50 = vector.extract_strided_slice %44 {offsets = [0, 256], sizes = [8, 128], strides = [1, 1]} : vector<8x384xf32> to vector<8x128xf32>
    %51 = arith.addf %45, %48 : vector<8x128xf32>
    %52 = arith.negf %51 : vector<8x128xf32>
    %53 = math.exp %52 : vector<8x128xf32>
    %cst_19 = arith.constant 1.000000e+00 : f32
    %54 = vector.broadcast %cst_19 : f32 to vector<8x128xf32>
    %55 = arith.addf %54, %53 : vector<8x128xf32>
    %56 = arith.divf %54, %55 : vector<8x128xf32>
    %57 = arith.addf %46, %49 : vector<8x128xf32>
    %58 = arith.negf %57 : vector<8x128xf32>
    %59 = math.exp %58 : vector<8x128xf32>
    %cst_20 = arith.constant 1.000000e+00 : f32
    %60 = vector.broadcast %cst_20 : f32 to vector<8x128xf32>
    %61 = arith.addf %60, %59 : vector<8x128xf32>
    %62 = arith.divf %60, %61 : vector<8x128xf32>
    %63 = arith.mulf %56, %50 : vector<8x128xf32>
    %64 = arith.addf %47, %63 : vector<8x128xf32>
    %65 = math.tanh %64 : vector<8x128xf32>
    %cst_21 = arith.constant 1.000000e+00 : f32
    %66 = vector.broadcast %cst_21 : f32 to vector<8x128xf32>
    %67 = arith.subf %66, %62 : vector<8x128xf32>
    %68 = arith.mulf %67, %65 : vector<8x128xf32>
    %69 = arith.mulf %62, %39 : vector<8x128xf32>
    %70 = arith.addf %68, %69 : vector<8x128xf32>
    %c0_22 = arith.constant 0 : index
    %c0_23 = arith.constant 0 : index
    %71 = vector.load %arg8[%c0_22, %c0_23] : memref<8x128xf32, #tpu.memory_space<vmem>>, vector<8x128xf32>
    tpu.vector_store %arg8[%c0_22, %c0_23], %37 {strides = array<i32>} : memref<8x128xf32, #tpu.memory_space<vmem>>, vector<8x128xf32>,
    %c0_24 = arith.constant 0 : index
    %c0_25 = arith.constant 0 : index
    %72 = vector.load %arg9[%c0_24, %c0_25] : memref<8x128xf32, #tpu.memory_space<vmem>>, vector<8x128xf32>
    tpu.vector_store %arg9[%c0_24, %c0_25], %70 {strides = array<i32>} : memref<8x128xf32, #tpu.memory_space<vmem>>, vector<8x128xf32>,
    %c0_26 = arith.constant 0 : index
    %c0_27 = arith.constant 0 : index
    %c0_28 = arith.constant 0 : index
    %73 = vector.load %arg6[%c0_26, %c0_27, %c0_28] : memref<1x8x128xf32, #tpu.memory_space<vmem>>, vector<1x8x128xf32>
    %74 = vector.shape_cast %73 : vector<1x8x128xf32> to vector<8x128xf32>
    %75 = vector.shape_cast %37 : vector<8x128xf32> to vector<1x8x128xf32>
    tpu.vector_store %arg6[%c0_26, %c0_27, %c0_28], %75 {strides = array<i32>} : memref<1x8x128xf32, #tpu.memory_space<vmem>>, vector<1x8x128xf32>,
    %c0_29 = arith.constant 0 : index
    %c0_30 = arith.constant 0 : index
    %c0_31 = arith.constant 0 : index
    %76 = vector.load %arg7[%c0_29, %c0_30, %c0_31] : memref<1x8x128xf32, #tpu.memory_space<vmem>>, vector<1x8x128xf32>
    %77 = vector.shape_cast %76 : vector<1x8x128xf32> to vector<8x128xf32>
    %78 = vector.shape_cast %70 : vector<8x128xf32> to vector<1x8x128xf32>
    tpu.vector_store %arg7[%c0_29, %c0_30, %c0_31], %78 {strides = array<i32>} : memref<1x8x128xf32, #tpu.memory_space<vmem>>, vector<1x8x128xf32>,
    return
  }
  func.func @transform_0(%arg0: i32) -> (i32, i32, i32) {
    %c0_i32 = arith.constant 0 : i32
    %c0_i32_0 = arith.constant 0 : i32
    %c0_i32_1 = arith.constant 0 : i32
    return %arg0, %c0_i32, %c0_i32_0 : i32, i32, i32
  }
  func.func @transform_1(%arg0: i32) -> (i32, i32) {
    %c0_i32 = arith.constant 0 : i32
    %c0_i32_0 = arith.constant 0 : i32
    %c0_i32_1 = arith.constant 0 : i32
    return %c0_i32, %c0_i32_0 : i32, i32
  }
  func.func @transform_2(%arg0: i32) -> (i32, i32) {
    %c0_i32 = arith.constant 0 : i32
    %c0_i32_0 = arith.constant 0 : i32
    %c0_i32_1 = arith.constant 0 : i32
    return %c0_i32, %c0_i32_0 : i32, i32
  }
  func.func @transform_3(%arg0: i32) -> (i32, i32) {
    %c0_i32 = arith.constant 0 : i32
    %c0_i32_0 = arith.constant 0 : i32
    %c0_i32_1 = arith.constant 0 : i32
    return %c0_i32, %c0_i32_0 : i32, i32
  }
  func.func @transform_4(%arg0: i32) -> (i32, i32) {
    %c0_i32 = arith.constant 0 : i32
    %c0_i32_0 = arith.constant 0 : i32
    %c0_i32_1 = arith.constant 0 : i32
    return %c0_i32, %c0_i32_0 : i32, i32
  }
  func.func @transform_5(%arg0: i32) -> (i32, i32, i32) {
    %c0_i32 = arith.constant 0 : i32
    %c0_i32_0 = arith.constant 0 : i32
    %c0_i32_1 = arith.constant 0 : i32
    return %arg0, %c0_i32, %c0_i32_0 : i32, i32, i32
  }
  func.func @transform_6(%arg0: i32) -> (i32, i32, i32) {
    %c0_i32 = arith.constant 0 : i32
    %c0_i32_0 = arith.constant 0 : i32
    %c0_i32_1 = arith.constant 0 : i32
    return %arg0, %c0_i32, %c0_i32_0 : i32, i32, i32
  }
}

</mosaic_0001>

<bundles_post_ra>
// kernel: retain_forward.5
= control target key start
LH: loop header
LB: loop body
LE: loop exit
PB: predicated region body
PF: predicated region fallthrough
CT: control target
= control target key end

     0   :  { %v795_v3 = vmov 0   ;;  %v123_v44 = vlaneseq  ;;  %vm157_vm0 = vcmask 1041409   ;;  %vm159_vm1 = vcmask 1042434   ;;  %s1153_s0 = inlined_call_operand.vmem [shape: f32[8,8,128], index: 0, kind: input, shape index: {}]   ;;  %s1154_s4 = inlined_call_operand.vmem [shape: f32[1,128], index: 4, kind: input, shape index: {}]   ;;  %s1155_s5 = inlined_call_operand.<no memory space> [shape: f32[1,1], index: 5, kind: input, shape index: {}]   ;;  %s1156_s6 = inlined_call_operand.vmem [shape: f32[128,128], index: 6, kind: input, shape index: {}]   ;;  %s1157_s1 = inlined_call_operand.vmem [shape: f32[8,8,128], index: 1, kind: input, shape index: {}]   ;;  %s1158_s3 = inlined_call_operand.vmem [shape: f32[8,8], index: 3, kind: input, shape index: {}]   ;;  %s1159_s8 = inlined_call_operand.vmem [shape: f32[128,4], index: 8, kind: input, shape index: {}]   ;;  %s1160_s11 = inlined_call_operand.vmem [shape: f32[8,8], index: 11, kind: output, shape index: {1}]   ;;  %s1161_s7 = inlined_call_operand.vmem [shape: f32[1,128], index: 7, kind: input, shape index: {}]   ;;  %s1162_s12 = inlined_call_operand.vmem [shape: f32[8,8,128], index: 12, kind: output, shape index: {2}]   ;;  %s1163_s2 = inlined_call_operand.vmem [shape: f32[8,8,128], index: 2, kind: input, shape index: {}]   ;;  %s1164_s9 = inlined_call_operand.vmem [shape: f32[1,4], index: 9, kind: input, shape index: {}]   ;;  %s1165_s10 = inlined_call_operand.vmem [shape: f32[8,4], index: 10, kind: output, shape index: {0}]  }
   0x1   :  { %v40_v0 = vld [vmem:[%s1153_s0] sm:$0xff]  ;;  %v41_v2 = vld [vmem:[%s1153_s0 + $0x8] sm:$0xff]  ;;  %774 = vset.pattern.permute.xlu0 %v795_v3  ;;  %v18_v4 = vstv %s1155_s5  ;;  %v42_v6 = vld [vmem:[%s1153_s0 + $0x10] sm:$0xff]  ;;  %vm161_vm2 = vcmask 1043459   ;;  %vm163_vm3 = vcmask 1044484   ;;  %vm165_vm4 = vcmask 1045509  }
   0x2   :  { %v590_v1 = vld [vmem:[%s1154_s4] ss:$0 sm:$0xff]  ;;  %v43_v7 = vld [vmem:[%s1153_s0 + $0x18] sm:$0xff]  ;;  %19 = vst [vmem:[#allocation2] sm:$0x1] %v18_v4  ;;  %v196_v11 = vld [vmem:[%s1156_s6 + $0x8] sm:$0xff] }
   0x3   :  { %v72_v5 = vmul.f32 %v590_v1, %v40_v0  ;;  %v74_v8 = vmul.f32 %v590_v1, %v42_v6  ;;  %v73_v9 = vmul.f32 %v590_v1, %v41_v2  ;;  %v195_v10 = vld [vmem:[%s1156_s6] sm:$0xff]  ;;  %v197_v12 = vld [vmem:[%s1156_s6 + $0x10] sm:$0xff]  ;;  %v75_v14 = vmul.f32 %v590_v1, %v43_v7  ;;  %v198_v16 = vld [vmem:[%s1156_s6 + $0x18] sm:$0xff] }
   0x4   :  { %v44_v13 = vld [vmem:[%s1153_s0 + $0x20] sm:$0xff]  ;;  %v714_v15 = vpack.c.bf16 %v196_v11, %v195_v10  ;;  %v45_v17 = vld [vmem:[%s1153_s0 + $0x28] sm:$0xff]  ;;  %v718_v18 = vpack.c.bf16 %v198_v16, %v197_v12  ;;  %v46_v22 = vld [vmem:[%s1153_s0 + $0x30] sm:$0xff]  ;;  %v124_v45 = vand.u32 127, %v123_v44  ;;  %v945_v46 = vshrl.u32 %v123_v44, 7 }
   0x5   :  { %80 = vadd.xlane.f32.xlu0 %v72_v5  ;;  %84 = vadd.xlane.f32.xlu1 %v74_v8  ;;  %v199_v19 = vld [vmem:[%s1156_s6 + $0x20] sm:$0xff]  ;;  %v200_v20 = vld [vmem:[%s1156_s6 + $0x28] sm:$0xff]  ;;  %v76_v21 = vmul.f32 %v590_v1, %v44_v13  ;;  %v77_v23 = vmul.f32 %v590_v1, %v45_v17  ;;  %v47_v26 = vld [vmem:[%s1153_s0 + $0x38] sm:$0xff]  ;;  %v78_v29 = vmul.f32 %v590_v1, %v46_v22  ;;  %v796_v10 = vmov 0.0|0.0  }
   0x6   :  { %715 = vmatprep.subr.bf16.mxu0 %v714_v15  ;;  %v722_v24 = vpack.c.bf16 %v200_v20, %v199_v19  ;;  %v48_v25 = vld [vmem:[%s1157_s1] sm:$0xff]  ;;  %v201_v27 = vld [vmem:[%s1156_s6 + $0x30] sm:$0xff]  ;;  %v202_v28 = vld [vmem:[%s1156_s6 + $0x38] sm:$0xff]  ;;  %v79_v30 = vmul.f32 %v590_v1, %v47_v26  ;;  %v948_v47 = vsub.s32 %v124_v45, %v945_v46  ;;  %v325_v56 = vsub.s32 0, %v945_v46  ;;  %746 = vmatprep.subr.bf16.mxu1 %v796_v10 }
   0x7   :  { %717 = vmatpush3.bf16.msra.mxu0 %v714_v15  ;;  %667 = vmatprep.mubr.f32.mxu0 %v48_v25  ;;  %v726_v31 = vpack.c.bf16 %v202_v28, %v201_v27  ;;  %v203_v32 = vld [vmem:[%s1156_s6 + $0x40] sm:$0xff]  ;;  %v204_v33 = vld [vmem:[%s1156_s6 + $0x48] sm:$0xff]  ;;  %v205_v35 = vld [vmem:[%s1156_s6 + $0x50] sm:$0xff]  ;;  %v332_v59 = vsub.s32 1, %v945_v46  ;;  %v339_v60 = vsub.s32 2, %v945_v46  ;;  %v346_v63 = vsub.s32 3, %v945_v46 }
   0x8   :  { %719 = vmatprep.subr.bf16.mxu0 %v718_v18  ;;  %v730_v34 = vpack.c.bf16 %v204_v33, %v203_v32  ;;  %v206_v36 = vld [vmem:[%s1156_s6 + $0x58] sm:$0xff]  ;;  %v207_v38 = vld [vmem:[%s1156_s6 + $0x60] sm:$0xff]  ;;  %v208_v39 = vld [vmem:[%s1156_s6 + $0x68] sm:$0xff]  ;;  %v353_v1 = vsub.s32 4, %v945_v46  ;;  %v360_v3 = vsub.s32 5, %v945_v46  ;;  %v367_v5 = vsub.s32 6, %v945_v46 }
   0x9   :  { %82 = vadd.xlane.f32.xlu0 %v73_v9  ;;  %86 = vadd.xlane.f32.xlu1 %v75_v14  ;;  %v734_v37 = vpack.c.bf16 %v206_v36, %v205_v35  ;;  %v738_v40 = vpack.c.bf16 %v208_v39, %v207_v38  ;;  %v209_v41 = vld [vmem:[%s1156_s6 + $0x70] sm:$0xff]  ;;  %v210_v42 = vld [vmem:[%s1156_s6 + $0x78] sm:$0xff]  ;;  %v591_v48 = vld [vmem:[#allocation2] ss:$0 sm:$0xff]  ;;  %v374_v7 = vsub.s32 7, %v945_v46  ;;  %vm167_vm5 = vcmask 1046534  }
   0xa   :  { %v742_v43 = vpack.c.bf16 %v210_v42, %v209_v41  ;;  %v49_v49 = vld [vmem:[%s1157_s1 + $0x8] sm:$0xff]  ;;  %v50_v50 = vld [vmem:[%s1157_s1 + $0x10] sm:$0xff]  ;;  %v51_v51 = vld [vmem:[%s1157_s1 + $0x18] sm:$0xff]  ;;  %vm169_vm6 = vcmask 1047559   ;;  %vm173_vm8 = vcmask 64512   ;;  %vm797_vm9 = vmmov 0  }
   0xb   :  { %721 = vmatpush3.bf16.msra.mxu0 %v718_v18  ;;  %v52_v52 = vld [vmem:[%s1157_s1 + $0x20] sm:$0xff]  ;;  %v53_v53 = vld [vmem:[%s1157_s1 + $0x28] sm:$0xff]  ;;  %v54_v54 = vld [vmem:[%s1157_s1 + $0x30] sm:$0xff]  ;;  %vm567_vm10 = vcmask 31744  }
   0xc   :  { %723 = vmatprep.subr.bf16.mxu0 %v722_v24  ;;  %v55_v55 = vld [vmem:[%s1157_s1 + $0x38] sm:$0xff]  ;;  %v975_v57 = vld [vmem:[%s1158_s3] sm:$0xff]  ;;  %v475_v12 = vld [vmem:[%s1159_s8 + $0x8] sm:$0xff] }
   0xd   :  { %88 = vadd.xlane.f32.xlu0 %v76_v21  ;;  %90 = vadd.xlane.f32.xlu1 %v77_v23  ;;  %v326_v58 = vrot.slane %v975_v57, %v325_v56  ;;  %v333_v61 = vrot.slane %v975_v57, %v332_v59  ;;  %v340_v62 = vrot.slane %v975_v57, %v339_v60  ;;  %v474_v11 = vld [vmem:[%s1159_s8] sm:$0xff]  ;;  %v476_v16 = vld [vmem:[%s1159_s8 + $0x10] sm:$0xff]  ;;  %v477_v17 = vld [vmem:[%s1159_s8 + $0x18] sm:$0xff]  ;;  %vm114_vm7 = vcmp.gt.f32.partialorder %v975_v57, 0.0 }
   0xe   :  { %v347_v0 = vrot.slane %v975_v57, %v346_v63  ;;  %v354_v2 = vrot.slane %v975_v57, %v353_v1  ;;  %v361_v4 = vrot.slane %v975_v57, %v360_v3  ;;  %v368_v6 = vrot.slane %v975_v57, %v367_v5  ;;  %v478_v19 = vld [vmem:[%s1159_s8 + $0x20] sm:$0xff]  ;;  %v479_v20 = vld [vmem:[%s1159_s8 + $0x28] sm:$0xff] }
   0xf   :  { %725 = vmatpush3.bf16.msra.mxu0 %v722_v24  ;;  %v375_v8 = vrot.slane %v975_v57, %v374_v7  ;;  %v747_v15 = vpack.c.bf16 %v475_v12, %v474_v11  ;;  %v750_v18 = vpack.c.bf16 %v477_v17, %v476_v16  ;;  %v753_v23 = vpack.c.bf16 %v479_v20, %v478_v19  ;;  %v480_v19 = vld [vmem:[%s1159_s8 + $0x30] sm:$0xff]  ;;  %v481_v20 = vld [vmem:[%s1159_s8 + $0x38] sm:$0xff] }
  0x10   :  { %727 = vmatprep.subr.bf16.mxu0 %v726_v31 }
  0x11   :  { %92 = vadd.xlane.f32.xlu0 %v78_v29  ;;  %94 = vadd.xlane.f32.xlu1 %v79_v30 }
  0x12   :  { %748 = vmatpush3.bf16.msra.mxu1 %v747_v15 }
  0x13   :  { %729 = vmatpush3.bf16.msra.mxu0 %v726_v31  ;;  %749 = vmatprep.subr.bf16.mxu1 %v796_v10 }
  0x14   :  { %731 = vmatprep.subr.bf16.mxu0 %v730_v34 }
  0x16   :  { %751 = vmatpush3.bf16.msra.mxu1 %v750_v18 }
  0x17   :  { %733 = vmatpush3.bf16.msra.mxu0 %v730_v34  ;;  %752 = vmatprep.subr.bf16.mxu1 %v796_v10 }
  0x18   :  { %735 = vmatprep.subr.bf16.mxu0 %v734_v37 }
  0x1a   :  { %754 = vmatpush3.bf16.msra.mxu1 %v753_v23  ;;  %v483_v23 = vld [vmem:[%s1159_s8 + $0x48] sm:$0xff] }
  0x1b   :  { %737 = vmatpush3.bf16.msra.mxu0 %v734_v37  ;;  %755 = vmatprep.subr.bf16.mxu1 %v796_v10 }
  0x1c   :  { %739 = vmatprep.subr.bf16.mxu0 %v738_v40 }
  0x1f   :  { %741 = vmatpush3.bf16.msra.mxu0 %v738_v40 }
  0x20   :  { %743 = vmatprep.subr.bf16.mxu0 %v742_v43 }
  0x22   :  { %328 = vbcast.lane.b32.xlu1 %v326_v58, 256 }
  0x23   :  { %745 = vmatpush3.bf16.msra.mxu0 %v742_v43 }
  0x26   :  { %668 = vmatmul.mubr.f32.vlgmr.msra.gmra.mrb[0].mxu0 %v49_v49  ;;  %335 = vbcast.lane.b32.xlu1 %v333_v61, 256 }
  0x27   :  { %103 = vperm.xlu0 %774, %v591_v48   ;;  %670 = vmatprep.mubr.f32.mxu0 %v50_v50 }
  0x2a   :  { %671 = vmatmul.mubr.f32.gmra.mrb[2].mxu0 %v51_v51  ;;  %342 = vbcast.lane.b32.xlu1 %v340_v62, 256 }
  0x2b   :  { %673 = vmatprep.mubr.f32.mxu0 %v52_v52 }
  0x2e   :  { %674 = vmatmul.mubr.f32.gmra.mrb[4].mxu0 %v53_v53  ;;  %349 = vbcast.lane.b32.xlu1 %v347_v0, 256 }
  0x2f   :  { %676 = vmatprep.mubr.f32.mxu0 %v54_v54 }
  0x32   :  { %677 = vmatmul.mubr.f32.gmra.mrb[6].mxu0 %v55_v55  ;;  %356 = vbcast.lane.b32.xlu1 %v354_v2, 256 }
  0x36   :  { %363 = vbcast.lane.b32.xlu1 %v361_v4, 256 }
  0x3a   :  { %370 = vbcast.lane.b32.xlu1 %v368_v6, 256 }
  0x3e   :  { %377 = vbcast.lane.b32.xlu1 %v375_v8, 256 }
  0x92   :  { %v81_v9 = vpop.xlane.xlu0 %80  ;;  %v85_v14 = vpop.xlane.xlu1 %84 }
  0x96   :  { %v83_v13 = vpop.xlane.xlu0 %82  ;;  %v87_v22 = vpop.xlane.xlu1 %86 }
  0x9a   :  { %v89_v21 = vpop.xlane.xlu0 %88  ;;  %v91_v25 = vpop.xlane.xlu1 %90 }
  0x9e   :  { %v93_v24 = vpop.xlane.xlu0 %92  ;;  %v95_v31 = vpop.xlane.xlu1 %94 }
  0xa2   :  { %v329_v18 = vpop.permute.xlu1 %328 }
  0xa6   :  { %v104_v26 = vpop.permute.xlu0 %103 }
  0xa7   :  { %v106_v27 = vadd.f32 %v104_v26, %v81_v9  ;;  %v107_v28 = vadd.f32 %v104_v26, %v83_v13  ;;  %v108_v29 = vadd.f32 %v104_v26, %v85_v14  ;;  %v109_v30 = vadd.f32 %v104_v26, %v87_v22  ;;  %v482_v22 = vld [vmem:[%s1159_s8 + $0x40] sm:$0xff] }
  0xa8   :  { %v110_v32 = vadd.f32 %v104_v26, %v89_v21  ;;  %v111_v33 = vadd.f32 %v104_v26, %v91_v25  ;;  %v112_v37 = vadd.f32 %v104_v26, %v93_v24  ;;  %v113_v38 = vadd.f32 %v104_v26, %v95_v31  ;;  %v336_v21 = vpop.permute.xlu1 %335  ;;  %v484_v25 = vld [vmem:[%s1159_s8 + $0x50] sm:$0xff]  ;;  %v485_v26 = vld [vmem:[%s1159_s8 + $0x58] sm:$0xff] }
  0xa9   :  { %v128_v34 = vrot.slane %v106_v27, %v948_v47  ;;  %v132_v35 = vrot.slane %v107_v28, %v948_v47  ;;  %v136_v36 = vrot.slane %v108_v29, %v948_v47  ;;  %v140_v39 = vrot.slane %v109_v30, %v948_v47 }
  0xaa   :  { %v144_v41 = vrot.slane %v110_v32, %v948_v47  ;;  %v148_v43 = vrot.slane %v111_v33, %v948_v47  ;;  %v152_v45 = vrot.slane %v112_v37, %v948_v47  ;;  %v156_v49 = vrot.slane %v113_v38, %v948_v47  ;;  %v486_v33 = vld [vmem:[%s1159_s8 + $0x60] sm:$0xff]  ;;  %v488_v37 = vld [vmem:[%s1159_s8 + $0x70] sm:$0xff]  ;;  %v489_v38 = vld [vmem:[%s1159_s8 + $0x78] sm:$0xff] }
  0xab   :  { %v158_v40 = vsel %vm157_vm0, %v132_v35, %v128_v34  ;;  %v759_v24 = vpack.c.bf16 %v483_v23, %v482_v22  ;;  %v762_v28 = vpack.c.bf16 %v485_v26, %v484_v25  ;;  %v487_v34 = vld [vmem:[%s1159_s8 + $0x68] sm:$0xff]  ;;  %v56_v22 = vld [vmem:[%s1163_s2] sm:$0xff] }
  0xac   :  { %v160_v42 = vsel %vm159_vm1, %v136_v36, %v158_v40  ;;  %v343_v30 = vpop.permute.xlu1 %342 }
  0xad   :  { %v162_v44 = vsel %vm161_vm2, %v140_v39, %v160_v42  ;;  %v768_v39 = vpack.c.bf16 %v489_v38, %v488_v37 }
  0xae   :  { %v164_v48 = vsel %vm163_vm3, %v144_v41, %v162_v44 }
  0xaf   :  { %v166_v50 = vsel %vm165_vm4, %v148_v43, %v164_v48  ;;  %v592_v43 = vld [vmem:[%s1161_s7] ss:$0 sm:$0xff] }
  0xb0   :  { %v168_v51 = vsel %vm167_vm5, %v152_v45, %v166_v50 }
  0xb1   :  { %v170_v52 = vsel %vm169_vm6, %v156_v49, %v168_v51 }
  0xb2   :  { %v172_v53 = vsel %vm114_vm7, %v170_v52, -1e+30 }
  0xb3   :  { %v174_v54 = vsel %vm173_vm8, %v172_v53, -inf }
  0xb4   :  { %v175_v55 = vrot.slane %v174_v54, 4 }
  0xb6   :  { %v176_v58 = vmax.f32 %v174_v54, %v175_v55 }
  0xb8   :  { %v177_v61 = vrot.slane %v176_v58, 2 }
  0xba   :  { %v178_v62 = vmax.f32 %v176_v58, %v177_v61 }
  0xbc   :  { %v179_v0 = vrot.slane %v178_v62, 1 }
  0xbe   :  { %v180_v2 = vmax.f32 %v178_v62, %v179_v0 }
  0xc0   :  { %v181_v4 = vsub.f32 %v172_v53, %v180_v2 }
  0xc2   :  { %v182_v6 = vmul.f32 1.442695, %v181_v4 }
  0xc4   :  { %775 = vpow2.f32 %v182_v6 }
  0xce   :  { %v776_v8 = vpop.eup %775 }
  0xcf   :  { %v184_v47 = vmul.f32 %v776_v8, %v975_v57  ;;  %v756_v57 = vpack.c.bf16 %v481_v20, %v480_v19 }
  0xd1   :  { %v185_v9 = vsel %vm173_vm8, %v184_v47, 0.0  ;;  %757 = vmatpush3.bf16.msra.mxu1 %v756_v57  ;;  %v57_v57 = vld [vmem:[%s1163_s2 + $0x8] sm:$0xff] }
  0xd2   :  { %v186_v11 = vrot.slane %v185_v9, 4  ;;  %758 = vmatprep.subr.bf16.mxu1 %v796_v10 }
  0xd4   :  { %v187_v12 = vadd.f32 %v186_v11, %v185_v9 }
  0xd5   :  { %760 = vmatpush3.bf16.msra.mxu1 %v759_v24 }
  0xd6   :  { %v188_v13 = vrot.slane %v187_v12, 2  ;;  %761 = vmatprep.subr.bf16.mxu1 %v796_v10 }
  0xd8   :  { %v189_v14 = vadd.f32 %v188_v13, %v187_v12 }
  0xd9   :  { %763 = vmatpush3.bf16.msra.mxu1 %v762_v28 }
  0xda   :  { %v190_v15 = vrot.slane %v189_v14, 1  ;;  %764 = vmatprep.subr.bf16.mxu1 %v796_v10 }
  0xdc   :  { %v191_v16 = vadd.f32 %v190_v15, %v189_v14 }
  0xde   :  { %v192_v17 = vmax.f32 %v191_v16, 1e-30 }
  0xe0   :  { %777 = vrcp.f32 %v192_v17 }
  0xea   :  { %v778_v27 = vpop.eup %777 }
  0xeb   :  { %v194_v29 = vmul.f32 %v778_v27, %v184_v47 }
  0xed   :  { %v405_v31 = vrot.slane %v194_v29, %v332_v59  ;;  %569 = vst.msk [vmem:[%s1160_s11] sm:$0xff] %vm173_vm8, %v194_v29  ;;  %v398_v32 = vrot.slane %v194_v29, %v325_v56  ;;  %v765_v59 = vpack.c.bf16 %v487_v34, %v486_v33  ;;  %v419_v35 = vrot.slane %v194_v29, %v346_v63  ;;  %v350_v56 = vpop.permute.xlu1 %349  ;;  %v59_v33 = vld [vmem:[%s1163_s2 + $0x18] sm:$0xff] }
  0xee   :  { %v412_v36 = vrot.slane %v194_v29, %v339_v60  ;;  %v798_v63 = vmov 0.0   ;;  %v433_v60 = vrot.slane %v194_v29, %v360_v3  ;;  %v426_v40 = vrot.slane %v194_v29, %v353_v1 }
  0xef   :  { %407 = vbcast.lane.b32.xlu1 %v405_v31, 256  ;;  %400 = vbcast.lane.b32.xlu0 %v398_v32, 256  ;;  %v447_v42 = vrot.slane %v194_v29, %v374_v7 }
  0xf0   :  { %766 = vmatpush3.bf16.msra.mxu1 %v765_v59  ;;  %711 = vmatprep.mubr.msk.f32.mxu1 %vm797_vm9, %v798_v63 }
  0xf1   :  { %767 = vmatprep.subr.bf16.mxu1 %v796_v10  ;;  %v357_v41 = vpop.permute.xlu1 %356  ;;  %v440_v10 = vrot.slane %v194_v29, %v367_v5  ;;  %v58_v29 = vld [vmem:[%s1163_s2 + $0x10] sm:$0xff] }
  0xf3   :  { %421 = vbcast.lane.b32.xlu1 %v419_v35, 256  ;;  %414 = vbcast.lane.b32.xlu0 %v412_v36, 256  ;;  %v60_v36 = vld [vmem:[%s1163_s2 + $0x20] sm:$0xff] }
  0xf4   :  { %769 = vmatpush3.bf16.msra.mxu1 %v768_v39 }
  0xf5   :  { %v364_v48 = vpop.permute.xlu1 %363 }
  0xf7   :  { %435 = vbcast.lane.b32.xlu1 %v433_v60, 256  ;;  %428 = vbcast.lane.b32.xlu0 %v426_v40, 256  ;;  %v61_v60 = vld [vmem:[%s1163_s2 + $0x28] sm:$0xff] }
  0xf9   :  { %v669_v3 = vpop.f32.mrb[0].mxu0  ;;  %v371_v55 = vpop.permute.xlu1 %370 }
  0xfa   :  { %v290_v44 = vadd.f32 %v669_v3, %v592_v43  ;;  %v284_v45 = vpop.f32.mrb[1].mxu0 }
  0xfb   :  { %449 = vbcast.lane.b32.xlu1 %v447_v42, 256  ;;  %442 = vbcast.lane.b32.xlu0 %v440_v10, 256  ;;  %v285_v1 = vadd.f32 %v592_v43, %v284_v45  ;;  %v62_v10 = vld [vmem:[%s1163_s2 + $0x30] sm:$0xff] }
  0xfc   :  { %v380_v49 = vmul.f32 %v336_v21, %v290_v44 }
  0xfd   :  { %v379_v50 = vmul.f32 %v329_v18, %v285_v1  ;;  %v672_v51 = vpop.f32.mrb[2].mxu0  ;;  %v378_v9 = vpop.permute.xlu1 %377 }
  0xfe   :  { %779 = vtanh.f32 %v380_v49  ;;  %v300_v52 = vadd.f32 %v672_v51, %v592_v43  ;;  %v294_v7 = vpop.f32.mrb[3].mxu0 }
  0xff   :  { %781 = vtanh.f32 %v379_v50  ;;  %v295_v46 = vadd.f32 %v592_v43, %v294_v7 }
 0x100   :  { %v382_v5 = vmul.f32 %v350_v56, %v300_v52 }
 0x101   :  { %v381_v53 = vmul.f32 %v343_v30, %v295_v46  ;;  %v675_v54 = vpop.f32.mrb[4].mxu0  ;;  %v593_v46 = vld [vmem:[%s1164_s9] ss:$0 sm:$0xff] }
 0x102   :  { %783 = vtanh.f32 %v382_v5  ;;  %v310_v58 = vadd.f32 %v675_v54, %v592_v43  ;;  %v304_v61 = vpop.f32.mrb[5].mxu0 }
 0x103   :  { %785 = vtanh.f32 %v381_v53  ;;  %v305_v62 = vadd.f32 %v592_v43, %v304_v61 }
 0x104   :  { %v384_v0 = vmul.f32 %v364_v48, %v310_v58  ;;  %v63_v48 = vld [vmem:[%s1163_s2 + $0x38] sm:$0xff] }
 0x105   :  { %v383_v2 = vmul.f32 %v357_v41, %v305_v62  ;;  %v678_v4 = vpop.f32.mrb[6].mxu0 }
 0x106   :  { %787 = vtanh.f32 %v384_v0  ;;  %v320_v6 = vadd.f32 %v678_v4, %v592_v43  ;;  %v314_v8 = vpop.f32.mrb[7].mxu0 }
 0x107   :  { %789 = vtanh.f32 %v383_v2  ;;  %v315_v47 = vadd.f32 %v592_v43, %v314_v8 }
 0x108   :  { %v780_v11 = vpop.eup %779  ;;  %v386_v12 = vmul.f32 %v378_v9, %v320_v6 }
 0x109   :  { %v782_v13 = vpop.eup %781  ;;  %571 = vst [vmem:[%s1162_s12 + $0x8] sm:$0xff] %v780_v11  ;;  %v385_v14 = vmul.f32 %v371_v55, %v315_v47 }
 0x10a   :  { %570 = vst [vmem:[%s1162_s12] sm:$0xff] %v782_v13  ;;  %791 = vtanh.f32 %v386_v12 }
 0x10b   :  { %793 = vtanh.f32 %v385_v14 }
 0x10c   :  { %v784_v15 = vpop.eup %783 }
 0x10d   :  { %v786_v16 = vpop.eup %785  ;;  %573 = vst [vmem:[%s1162_s12 + $0x18] sm:$0xff] %v784_v15 }
 0x10e   :  { %572 = vst [vmem:[%s1162_s12 + $0x10] sm:$0xff] %v786_v16 }
 0x110   :  { %v788_v17 = vpop.eup %787 }
 0x111   :  { %v790_v18 = vpop.eup %789  ;;  %575 = vst [vmem:[%s1162_s12 + $0x28] sm:$0xff] %v788_v17 }
 0x112   :  { %574 = vst [vmem:[%s1162_s12 + $0x20] sm:$0xff] %v790_v18 }
 0x114   :  { %v792_v19 = vpop.eup %791 }
 0x115   :  { %v794_v20 = vpop.eup %793  ;;  %577 = vst [vmem:[%s1162_s12 + $0x38] sm:$0xff] %v792_v19 }
 0x116   :  { %576 = vst [vmem:[%s1162_s12 + $0x30] sm:$0xff] %v794_v20 }
 0x161   :  { %v408_v21 = vpop.permute.xlu1 %407  ;;  %v401_v23 = vpop.permute.xlu0 %400 }
 0x162   :  { %v452_v24 = vmul.f32 %v780_v11, %v408_v21  ;;  %v451_v25 = vmul.f32 %v782_v13, %v401_v23 }
 0x164   :  { %v460_v26 = vmul.f32 %v452_v24, %v57_v57  ;;  %v459_v27 = vmul.f32 %v451_v25, %v56_v22 }
 0x165   :  { %v422_v28 = vpop.permute.xlu1 %421  ;;  %v415_v30 = vpop.permute.xlu0 %414 }
 0x166   :  { %v454_v31 = vmul.f32 %v784_v15, %v422_v28  ;;  %v453_v32 = vmul.f32 %v786_v16, %v415_v30  ;;  %v467_v34 = vadd.f32 %v460_v26, %v459_v27 }
 0x168   :  { %v461_v59 = vmul.f32 %v453_v32, %v58_v29  ;;  %v462_v37 = vmul.f32 %v454_v31, %v59_v33 }
 0x169   :  { %v436_v35 = vpop.permute.xlu1 %435  ;;  %v429_v56 = vpop.permute.xlu0 %428 }
 0x16a   :  { %v468_v38 = vadd.f32 %v467_v34, %v461_v59  ;;  %v456_v39 = vmul.f32 %v788_v17, %v436_v35  ;;  %v455_v63 = vmul.f32 %v790_v18, %v429_v56 }
 0x16c   :  { %v469_v40 = vadd.f32 %v468_v38, %v462_v37  ;;  %v463_v41 = vmul.f32 %v455_v63, %v60_v36  ;;  %v464_v3 = vmul.f32 %v456_v39, %v61_v60 }
 0x16d   :  { %v450_v42 = vpop.permute.xlu1 %449  ;;  %v443_v43 = vpop.permute.xlu0 %442 }
 0x16e   :  { %v470_v44 = vadd.f32 %v469_v40, %v463_v41  ;;  %v458_v45 = vmul.f32 %v792_v19, %v450_v42  ;;  %v457_v1 = vmul.f32 %v794_v20, %v443_v43 }
 0x170   :  { %v471_v49 = vadd.f32 %v470_v44, %v464_v3  ;;  %v465_v50 = vmul.f32 %v457_v1, %v62_v10  ;;  %v466_v51 = vmul.f32 %v458_v45, %v63_v48 }
 0x172   :  { %v472_v52 = vadd.f32 %v471_v49, %v465_v50 }
 0x174   :  { %v473_v7 = vadd.f32 %v472_v52, %v466_v51 }
 0x176   :  { %712 = vmatmul.mubr.f32.vlgmr.msra.gmra.mrb[0].mxu1 %v473_v7 }
 0x249   :  { %v563_v5 = vpop.f32.mrb[0].mxu1 }
 0x24a   :  { %v564_v53 = vadd.f32 %v593_v46, %v563_v5  ;;  %v713_v54 = vpop.f32.mrb[1].mxu1 }
 0x24c   :  { %568 = vst.msk [vmem:[%s1165_s10] sm:$0xff] %vm567_vm10, %v564_v53 }

// kernel: retain_forward.4
= control target key start
LH: loop header
LB: loop body
LE: loop exit
PB: predicated region body
PF: predicated region fallthrough
CT: control target
= control target key end

     0   :  { %s1128_s21 = smov 0   ;;  %s1493_s0 = inlined_call_operand.vmem [shape: f32[8,8,768], index: 0, kind: input, shape index: {}]   ;;  %s1494_s1 = inlined_call_operand.vmem [shape: f32[128,384], index: 1, kind: input, shape index: {}]   ;;  %s1495_s2 = inlined_call_operand.vmem [shape: f32[1,384], index: 2, kind: input, shape index: {}]   ;;  %s1496_s3 = inlined_call_operand.vmem [shape: f32[128,384], index: 3, kind: input, shape index: {}]   ;;  %s1497_s4 = inlined_call_operand.vmem [shape: f32[1,384], index: 4, kind: input, shape index: {}]   ;;  %s1498_s5 = inlined_call_operand.vmem [shape: f32[8,8,128], index: 5, kind: output, shape index: {0}]   ;;  %s1499_s6 = inlined_call_operand.vmem [shape: f32[8,8,128], index: 6, kind: output, shape index: {1}]  }
   0x1 LB: > { %s817_s22 = sadd.s32 4294967295, %s1087_s21   ;;  %p821_p0 = scmp.ge.s32.totalorder %s1087_s21, 1  ;;  %s1087_s21 = sphi %s1128_s21, %s17_s21  }
   0x2   : > { %p215_p1 = scmp.lt.s32.totalorder %s1087_s21, 9 }
   0x4   : > { %p216_p2 = pnand %p821_p0, %p215_p1 }
   0x5   : > { %p248_p3 = scmp.lt.s32.totalorder (!%p216_p2), %s817_s22, 7  ;;  %p825_p4 = scmp.ne.s32.totalorder (!%p216_p2), %s817_s22, 0 }
   0x6   : > { %219 = sbr.rel (%p216_p2) target bundleno = 350 (0x15e), region = 40 }
   0xd   : > { %s249_s23 = scalar_select %p248_p3, %s817_s22, 7 }
   0xe   : > { %264 = sbr.rel (%p825_p4) target bundleno = 21 (0x15), region = 44  ;;  %v1089_v0 = vmov (!%p825_p4), 0.0  }
   0xf   : > { %s1048_s24 = smul.u32 48, %s249_s23  ;;  %s823_s25 = sshll.u32 %s249_s23, 3  ;;  %265 = vst [vmem:[#allocation2] sm:$0xff] (!%p825_p4), %v1089_v0  ;;  %266 = vst [vmem:[#allocation3] sm:$0xff] (!%p825_p4), %v1089_v0 }
  0x10   : > { %s1139_s28 = scalar_lea.vmem %s1498_s5, %s823_s25  ;;  %s1144_s7 = scalar_lea.vmem %s1499_s6, %s823_s25 }
  0x11   : > { %s1149_s10 = scalar_lea.vmem %s1493_s0, %s1048_s24 }
  0x15 PF: > { %v275_v1 = vld [vmem:[%s1494_s1 + $0x8] sm:$0xff]  ;;  %v278_v2 = vld [vmem:[%s1494_s1 + $0x20] sm:$0xff]  ;;  %v277_v5 = vld [vmem:[%s1494_s1 + $0x18] sm:$0xff]  ;;  %v1090_v8 = vmov 0.0|0.0   ;;  %v1091_v9 = vmov 0.0   ;;  %vm1092_vm0 = vmmov 0  }
  0x16   : > { %v274_v3 = vld [vmem:[%s1494_s1] sm:$0xff]  ;;  %v936_v4 = vpack.c.bf16 %v278_v2, %v275_v1  ;;  %v281_v6 = vld [vmem:[%s1494_s1 + $0x38] sm:$0xff]  ;;  %v284_v7 = vld [vmem:[%s1494_s1 + $0x50] sm:$0xff]  ;;  %968 = vmatprep.subr.bf16.mxu1 %v1090_v8  ;;  %403 = vmatprep.mubr.f32.mxu0 %v1091_v9 }
  0x17   : > { %v938_v10 = vpack.c.bf16 %v277_v5, %v274_v3  ;;  %v940_v11 = vpack.c.bf16 %v284_v7, %v281_v6  ;;  %v280_v12 = vld [vmem:[%s1494_s1 + $0x30] sm:$0xff]  ;;  %v283_v13 = vld [vmem:[%s1494_s1 + $0x48] sm:$0xff]  ;;  %898 = vmatprep.mubr.msk.f32.mxu1 %vm1092_vm0, %v1091_v9  ;;  %v290_v15 = vld [vmem:[%s1494_s1 + $0x80] sm:$0xff] }
  0x18   : > { %v287_v14 = vld [vmem:[%s1494_s1 + $0x68] sm:$0xff]  ;;  %937 = vmatprep.subr.bf16.mxu0 %v936_v4  ;;  %v942_v16 = vpack.c.bf16 %v283_v13, %v280_v12  ;;  %v286_v18 = vld [vmem:[%s1494_s1 + $0x60] sm:$0xff]  ;;  %v289_v19 = vld [vmem:[%s1494_s1 + $0x78] sm:$0xff] }
  0x19   : > { %939 = vmatpush1.bf16.msra.mxu0 %v938_v10  ;;  %v944_v17 = vpack.c.bf16 %v290_v15, %v287_v14  ;;  %v293_v20 = vld [vmem:[%s1494_s1 + $0x98] sm:$0xff]  ;;  %v296_v21 = vld [vmem:[%s1494_s1 + $0xb0] sm:$0xff]  ;;  %v946_v22 = vpack.c.bf16 %v289_v19, %v286_v18  ;;  %v295_v25 = vld [vmem:[%s1494_s1 + $0xa8] sm:$0xff] }
  0x1a   : > { %941 = vmatprep.subr.bf16.mxu0 %v940_v11  ;;  %v948_v23 = vpack.c.bf16 %v296_v21, %v293_v20  ;;  %v292_v24 = vld [vmem:[%s1494_s1 + $0x90] sm:$0xff]  ;;  %v299_v26 = vld [vmem:[%s1494_s1 + $0xc8] sm:$0xff]  ;;  %v302_v27 = vld [vmem:[%s1494_s1 + $0xe0] sm:$0xff] }
  0x1b   : > { %v276_v28 = vld [vmem:[%s1494_s1 + $0x10] sm:$0xff]  ;;  %v279_v29 = vld [vmem:[%s1494_s1 + $0x28] sm:$0xff]  ;;  %v282_v31 = vld [vmem:[%s1494_s1 + $0x40] sm:$0xff]  ;;  %v950_v32 = vpack.c.bf16 %v295_v25, %v292_v24  ;;  %v952_v34 = vpack.c.bf16 %v302_v27, %v299_v26 }
  0x1c   : > { %v969_v30 = vpack.c.bf16 %v279_v29, %v276_v28  ;;  %v285_v33 = vld [vmem:[%s1494_s1 + $0x58] sm:$0xff]  ;;  %v298_v35 = vld [vmem:[%s1494_s1 + $0xc0] sm:$0xff]  ;;  %v308_v39 = vld [vmem:[%s1494_s1 + $0x110] sm:$0xff] }
  0x1d   : > { %943 = vmatpush1.bf16.msra.mxu0 %v942_v16  ;;  %v301_v36 = vld [vmem:[%s1494_s1 + $0xd8] sm:$0xff]  ;;  %v972_v38 = vpack.c.bf16 %v285_v33, %v282_v31  ;;  %v288_v40 = vld [vmem:[%s1494_s1 + $0x70] sm:$0xff]  ;;  %v291_v41 = vld [vmem:[%s1494_s1 + $0x88] sm:$0xff] }
  0x1e   : > { %945 = vmatprep.subr.bf16.mxu0 %v944_v17  ;;  %v305_v37 = vld [vmem:[%s1494_s1 + $0xf8] sm:$0xff]  ;;  %970 = vmatpush3.bf16.msra.mxu1 %v969_v30  ;;  %v954_v42 = vpack.c.bf16 %v301_v36, %v298_v35  ;;  %v304_v44 = vld [vmem:[%s1494_s1 + $0xf0] sm:$0xff]  ;;  %v307_v45 = vld [vmem:[%s1494_s1 + $0x108] sm:$0xff]  ;;  %v975_v47 = vpack.c.bf16 %v291_v41, %v288_v40 }
  0x1f   : > { %971 = vmatprep.subr.bf16.mxu1 %v1090_v8  ;;  %v956_v43 = vpack.c.bf16 %v308_v39, %v305_v37  ;;  %v311_v46 = vld [vmem:[%s1494_s1 + $0x128] sm:$0xff]  ;;  %v314_v48 = vld [vmem:[%s1494_s1 + $0x140] sm:$0xff]  ;;  %v297_v50 = vld [vmem:[%s1494_s1 + $0xb8] sm:$0xff]  ;;  %v958_v51 = vpack.c.bf16 %v307_v45, %v304_v44 }
  0x20   : > { %v294_v49 = vld [vmem:[%s1494_s1 + $0xa0] sm:$0xff]  ;;  %v960_v52 = vpack.c.bf16 %v314_v48, %v311_v46  ;;  %v313_v54 = vld [vmem:[%s1494_s1 + $0x138] sm:$0xff]  ;;  %v320_v57 = vld [vmem:[%s1494_s1 + $0x170] sm:$0xff] }
  0x21   : > { %947 = vmatpush1.bf16.msra.mxu0 %v946_v22  ;;  %v310_v53 = vld [vmem:[%s1494_s1 + $0x120] sm:$0xff]  ;;  %v317_v55 = vld [vmem:[%s1494_s1 + $0x158] sm:$0xff]  ;;  %v978_v56 = vpack.c.bf16 %v297_v50, %v294_v49  ;;  %v300_v58 = vld [vmem:[%s1494_s1 + $0xd0] sm:$0xff] }
  0x22   : > { %949 = vmatprep.subr.bf16.mxu0 %v948_v23  ;;  %973 = vmatpush3.bf16.msra.mxu1 %v972_v38  ;;  %v303_v59 = vld [vmem:[%s1494_s1 + $0xe8] sm:$0xff]  ;;  %v962_v60 = vpack.c.bf16 %v313_v54, %v310_v53  ;;  %v964_v61 = vpack.c.bf16 %v320_v57, %v317_v55  ;;  %v316_v62 = vld [vmem:[%s1494_s1 + $0x150] sm:$0xff]  ;;  %v506_v2 = vld [vmem:[%s1496_s3 + $0x20] sm:$0xff] }
  0x23   : > { %974 = vmatprep.subr.bf16.mxu1 %v1090_v8  ;;  %v319_v63 = vld [vmem:[%s1494_s1 + $0x168] sm:$0xff]  ;;  %v981_v1 = vpack.c.bf16 %v303_v59, %v300_v58  ;;  %v306_v3 = vld [vmem:[%s1494_s1 + $0x100] sm:$0xff]  ;;  %v309_v4 = vld [vmem:[%s1494_s1 + $0x118] sm:$0xff] }
  0x24   : > { %v503_v0 = vld [vmem:[%s1496_s3 + $0x8] sm:$0xff]  ;;  %v966_v5 = vpack.c.bf16 %v319_v63, %v316_v62  ;;  %v502_v7 = vld [vmem:[%s1496_s3] sm:$0xff]  ;;  %v505_v10 = vld [vmem:[%s1496_s3 + $0x18] sm:$0xff]  ;;  %v984_v12 = vpack.c.bf16 %v309_v4, %v306_v3 }
  0x25   : > { %951 = vmatpush1.bf16.msra.mxu0 %v950_v32  ;;  %v992_v6 = vpack.c.bf16 %v506_v2, %v503_v0  ;;  %v509_v11 = vld [vmem:[%s1496_s3 + $0x38] sm:$0xff]  ;;  %v512_v13 = vld [vmem:[%s1496_s3 + $0x50] sm:$0xff]  ;;  %v315_v15 = vld [vmem:[%s1494_s1 + $0x148] sm:$0xff]  ;;  %v994_v17 = vpack.c.bf16 %v505_v10, %v502_v7 }
  0x26   : > { %953 = vmatprep.subr.bf16.mxu0 %v952_v34  ;;  %976 = vmatpush3.bf16.msra.mxu1 %v975_v47  ;;  %v312_v14 = vld [vmem:[%s1494_s1 + $0x130] sm:$0xff]  ;;  %v1316_v16 = vld [vmem:[#allocation2] sm:$0xff]  ;;  %v996_v18 = vpack.c.bf16 %v512_v13, %v509_v11  ;;  %v511_v20 = vld [vmem:[%s1496_s3 + $0x48] sm:$0xff] }
  0x27   : > { %977 = vmatprep.subr.bf16.mxu1 %v1090_v8  ;;  %v508_v19 = vld [vmem:[%s1496_s3 + $0x30] sm:$0xff]  ;;  %v515_v21 = vld [vmem:[%s1496_s3 + $0x68] sm:$0xff]  ;;  %v987_v22 = vpack.c.bf16 %v315_v15, %v312_v14  ;;  %v518_v23 = vld [vmem:[%s1496_s3 + $0x80] sm:$0xff] }
  0x28   : > { %v318_v24 = vld [vmem:[%s1494_s1 + $0x160] sm:$0xff]  ;;  %v321_v25 = vld [vmem:[%s1494_s1 + $0x178] sm:$0xff]  ;;  %v998_v26 = vpack.c.bf16 %v511_v20, %v508_v19  ;;  %v1000_v27 = vpack.c.bf16 %v518_v23, %v515_v21  ;;  %v524_v32 = vld [vmem:[%s1496_s3 + $0xb0] sm:$0xff] }
  0x29   : > { %955 = vmatpush1.bf16.msra.mxu0 %v954_v42  ;;  %v514_v28 = vld [vmem:[%s1496_s3 + $0x60] sm:$0xff]  ;;  %v517_v29 = vld [vmem:[%s1496_s3 + $0x78] sm:$0xff]  ;;  %v990_v31 = vpack.c.bf16 %v321_v25, %v318_v24  ;;  %v504_v33 = vld [vmem:[%s1496_s3 + $0x10] sm:$0xff]  ;;  %v324_v25 = vlaneseq }
  0x2a   : > { %957 = vmatprep.subr.bf16.mxu0 %v956_v43  ;;  %979 = vmatpush3.bf16.msra.mxu1 %v978_v56  ;;  %v521_v30 = vld [vmem:[%s1496_s3 + $0x98] sm:$0xff]  ;;  %v507_v34 = vld [vmem:[%s1496_s3 + $0x28] sm:$0xff]  ;;  %v1002_v35 = vpack.c.bf16 %v517_v29, %v514_v28  ;;  %v520_v37 = vld [vmem:[%s1496_s3 + $0x90] sm:$0xff] }
  0x2b   : > { %980 = vmatprep.subr.bf16.mxu1 %v1090_v8  ;;  %v1004_v36 = vpack.c.bf16 %v524_v32, %v521_v30  ;;  %v523_v38 = vld [vmem:[%s1496_s3 + $0xa8] sm:$0xff]  ;;  %v1025_v40 = vpack.c.bf16 %v507_v34, %v504_v33  ;;  %v530_v41 = vld [vmem:[%s1496_s3 + $0xe0] sm:$0xff]  ;;  %v513_v43 = vld [vmem:[%s1496_s3 + $0x58] sm:$0xff] }
  0x2c   : > { %v527_v39 = vld [vmem:[%s1496_s3 + $0xc8] sm:$0xff]  ;;  %v510_v42 = vld [vmem:[%s1496_s3 + $0x40] sm:$0xff]  ;;  %v1006_v44 = vpack.c.bf16 %v523_v38, %v520_v37  ;;  %v529_v47 = vld [vmem:[%s1496_s3 + $0xd8] sm:$0xff] }
  0x2d   : > { %959 = vmatpush1.bf16.msra.mxu0 %v958_v51  ;;  %v1008_v45 = vpack.c.bf16 %v530_v41, %v527_v39  ;;  %v526_v46 = vld [vmem:[%s1496_s3 + $0xc0] sm:$0xff]  ;;  %v533_v48 = vld [vmem:[%s1496_s3 + $0xf8] sm:$0xff]  ;;  %v1028_v49 = vpack.c.bf16 %v513_v43, %v510_v42  ;;  %v536_v50 = vld [vmem:[%s1496_s3 + $0x110] sm:$0xff] }
  0x2e   : > { %961 = vmatprep.subr.bf16.mxu0 %v960_v52  ;;  %982 = vmatpush3.bf16.msra.mxu1 %v981_v1  ;;  %v516_v51 = vld [vmem:[%s1496_s3 + $0x70] sm:$0xff]  ;;  %v519_v52 = vld [vmem:[%s1496_s3 + $0x88] sm:$0xff]  ;;  %v1010_v53 = vpack.c.bf16 %v529_v47, %v526_v46  ;;  %v1012_v54 = vpack.c.bf16 %v536_v50, %v533_v48  ;;  %v522_v59 = vld [vmem:[%s1496_s3 + $0xa0] sm:$0xff] }
  0x2f   : > { %983 = vmatprep.subr.bf16.mxu1 %v1090_v8  ;;  %v532_v55 = vld [vmem:[%s1496_s3 + $0xf0] sm:$0xff]  ;;  %v535_v56 = vld [vmem:[%s1496_s3 + $0x108] sm:$0xff]  ;;  %v1031_v58 = vpack.c.bf16 %v519_v52, %v516_v51  ;;  %v538_v63 = vld [vmem:[%s1496_s3 + $0x120] sm:$0xff] }
  0x30   : > { %v539_v57 = vld [vmem:[%s1496_s3 + $0x128] sm:$0xff]  ;;  %v541_v0 = vld [vmem:[%s1496_s3 + $0x138] sm:$0xff]  ;;  %v548_v3 = vld [vmem:[%s1496_s3 + $0x170] sm:$0xff] }
  0x31   : > { %963 = vmatpush1.bf16.msra.mxu0 %v962_v60  ;;  %v525_v60 = vld [vmem:[%s1496_s3 + $0xb8] sm:$0xff]  ;;  %v528_v4 = vld [vmem:[%s1496_s3 + $0xd0] sm:$0xff]  ;;  %v547_v11 = vld [vmem:[%s1496_s3 + $0x168] sm:$0xff] }
  0x32   : > { %965 = vmatprep.subr.bf16.mxu0 %v964_v61  ;;  %985 = vmatpush3.bf16.msra.mxu1 %v984_v12  ;;  %v1014_v61 = vpack.c.bf16 %v535_v56, %v532_v55  ;;  %v545_v1 = vld [vmem:[%s1496_s3 + $0x158] sm:$0xff]  ;;  %v1034_v2 = vpack.c.bf16 %v525_v60, %v522_v59  ;;  %v544_v10 = vld [vmem:[%s1496_s3 + $0x150] sm:$0xff]  ;;  %v534_v13 = vld [vmem:[%s1496_s3 + $0x100] sm:$0xff] }
  0x33   : > { %986 = vmatprep.subr.bf16.mxu1 %v1090_v8  ;;  %v1020_v7 = vpack.c.bf16 %v548_v3, %v545_v1  ;;  %v537_v14 = vld [vmem:[%s1496_s3 + $0x118] sm:$0xff]  ;;  %v1022_v15 = vpack.c.bf16 %v547_v11, %v544_v10  ;;  %v543_v19 = vld [vmem:[%s1496_s3 + $0x148] sm:$0xff]  ;;  %v322_v28 = vld [vmem:[%s1495_s2] sm:$0x7] }
  0x34   : > { %v1457_v20 = vld [vmem:[#allocation3] sm:$0xff]  ;;  %v549_v23 = vld [vmem:[%s1496_s3 + $0x178] sm:$0xff]  ;;  %v267_v32 = vld [vmem:[%s1149_s10] sm:$0xff] }
  0x35   : > { %967 = vmatpush1.bf16.msra.mxu0 %v966_v5  ;;  %v531_v5 = vld [vmem:[%s1496_s3 + $0xe8] sm:$0xff]  ;;  %v550_v48 = vld [vmem:[%s1497_s4] sm:$0x7]  ;;  %v270_v56 = vld [vmem:[%s1149_s10 + $0x18] sm:$0xff] }
  0x36   : > { %993 = vmatprep.subr.bf16.mxu0 %v992_v6  ;;  %988 = vmatpush3.bf16.msra.mxu1 %v987_v22  ;;  %v1018_v6 = vpack.c.bf16 %v541_v0, %v538_v63  ;;  %v1037_v12 = vpack.c.bf16 %v531_v5, %v528_v4  ;;  %v546_v22 = vld [vmem:[%s1496_s3 + $0x160] sm:$0xff]  ;;  %v268_v37 = vld [vmem:[%s1149_s10 + $0x8] sm:$0xff] }
  0x37   : > { %989 = vmatprep.subr.bf16.mxu1 %v1090_v8  ;;  %v1046_v24 = vpack.c.bf16 %v549_v23, %v546_v22 }
  0x38   : > { %404 = vmatmul.mubr.f32.vlgmr.msra.gmra.mrb[0].mxu0 %v1316_v16 }
  0x39   : > { %995 = vmatpush1.bf16.msra.mxu0 %v994_v17  ;;  %631 = vmatprep.mubr.f32.mxu0 %v1091_v9  ;;  %v1040_v17 = vpack.c.bf16 %v537_v14, %v534_v13 }
  0x3a   : > { %997 = vmatprep.subr.bf16.mxu0 %v996_v18  ;;  %991 = vmatpush3.bf16.msra.mxu1 %v990_v31  ;;  %v540_v18 = vld [vmem:[%s1496_s3 + $0x130] sm:$0xff] }
  0x3b   : > { %1024 = vmatprep.subr.bf16.mxu1 %v1090_v8  ;;  %v1043_v21 = vpack.c.bf16 %v543_v19, %v540_v18 }
  0x3d   : > { %999 = vmatpush1.bf16.msra.mxu0 %v998_v26  ;;  %899 = vmatmul.mubr.f32.vlgmr.msra.gmra.mrb[0].mxu1 %v1316_v16  ;;  %v1469_v26 = vshrl.u32 %v324_v25, 7 }
  0x3e   : > { %1001 = vmatprep.subr.bf16.mxu0 %v1000_v27  ;;  %1026 = vmatpush3.bf16.msra.mxu1 %v1025_v40 }
  0x3f   : > { %1027 = vmatprep.subr.bf16.mxu1 %v1090_v8  ;;  %933 = vmatprep.mubr.msk.f32.mxu1 %vm1092_vm0, %v1091_v9  ;;  %v542_v9 = vld [vmem:[%s1496_s3 + $0x140] sm:$0xff]  ;;  %v326_v27 = vsub.s32 0, %v1469_v26  ;;  %v330_v29 = vsub.s32 1, %v1469_v26 }
  0x40   : > { %v1016_v62 = vpack.c.bf16 %v542_v9, %v539_v57 }
  0x41   : > { %1003 = vmatpush1.bf16.msra.mxu0 %v1002_v35  ;;  %v327_v30 = vrot.slane %v322_v28, %v326_v27  ;;  %v331_v31 = vrot.slane %v322_v28, %v330_v29  ;;  %v555_v51 = vrot.slane %v550_v48, %v326_v27 }
  0x42   : > { %1005 = vmatprep.subr.bf16.mxu0 %v1004_v36  ;;  %1029 = vmatpush3.bf16.msra.mxu1 %v1028_v49 }
  0x43   : > { %1030 = vmatprep.subr.bf16.mxu1 %v1090_v8 }
  0x45   : > { %1007 = vmatpush1.bf16.msra.mxu0 %v1006_v44 }
  0x46   : > { %1009 = vmatprep.subr.bf16.mxu0 %v1008_v45  ;;  %1032 = vmatpush3.bf16.msra.mxu1 %v1031_v58  ;;  %v334_v45 = vsub.s32 2, %v1469_v26 }
  0x47   : > { %1033 = vmatprep.subr.bf16.mxu1 %v1090_v8 }
  0x48   : > { %v335_v46 = vrot.slane %v322_v28, %v334_v45  ;;  %v563_v14 = vrot.slane %v550_v48, %v334_v45 }
  0x49   : > { %1011 = vmatpush1.bf16.msra.mxu0 %v1010_v53  ;;  %v269_v53 = vld [vmem:[%s1149_s10 + $0x10] sm:$0xff] }
  0x4a   : > { %1013 = vmatprep.subr.bf16.mxu0 %v1012_v54  ;;  %1035 = vmatpush3.bf16.msra.mxu1 %v1034_v2  ;;  %v559_v54 = vrot.slane %v550_v48, %v330_v29 }
  0x4b   : > { %1036 = vmatprep.subr.bf16.mxu1 %v1090_v8 }
  0x4d   : > { %1015 = vmatpush1.bf16.msra.mxu0 %v1014_v61 }
  0x4e   : > { %1017 = vmatprep.subr.bf16.mxu0 %v1016_v62  ;;  %1038 = vmatpush3.bf16.msra.mxu1 %v1037_v12  ;;  %v271_v62 = vld [vmem:[%s1149_s10 + $0x20] sm:$0xff] }
  0x4f   : > { %1039 = vmatprep.subr.bf16.mxu1 %v1090_v8 }
  0x51   : > { %1019 = vmatpush1.bf16.msra.mxu0 %v1018_v6 }
  0x52   : > { %1021 = vmatprep.subr.bf16.mxu0 %v1020_v7  ;;  %1041 = vmatpush3.bf16.msra.mxu1 %v1040_v17 }
  0x53   : > { %1042 = vmatprep.subr.bf16.mxu1 %v1090_v8 }
  0x55   : > { %1023 = vmatpush1.bf16.msra.mxu0 %v1022_v15 }
  0x56   : > { %1044 = vmatpush3.bf16.msra.mxu1 %v1043_v21  ;;  %v272_v21 = vld [vmem:[%s1149_s10 + $0x28] sm:$0xff] }
  0x57   : > { %1045 = vmatprep.subr.bf16.mxu1 %v1090_v8 }
  0x58   : > { %632 = vmatmul.mubr.f32.vlgmr.msra.gmra.mrb[2].mxu0 %v1457_v20 }
  0x5a   : > { %1047 = vmatpush3.bf16.msra.mxu1 %v1046_v24 }
  0x5d   : > { %934 = vmatmul.mubr.f32.vlgmr.msra.gmra.mrb[2].mxu1 %v1457_v20 }
 0x10b   : > { %v405_v33 = vpop.f32.mrb[0].mxu0 }
 0x10c   : > { %v406_v8 = vadd.f32 %v405_v33, %v327_v30  ;;  %v407_v34 = vpop.f32.mrb[1].mxu0 }
 0x10d   : > { %v408_v35 = vadd.f32 %v407_v34, %v331_v31 }
 0x10e   : > { %v480_v36 = vadd.f32 %v406_v8, %v267_v32 }
 0x10f   : > { %v487_v39 = vadd.f32 %v408_v35, %v268_v37 }
 0x110   : > { %v826_v38 = vmul.f32 -1.442695, %v480_v36  ;;  %v476_v40 = vpop.f32.mrb[0].mxu1 }
 0x111   : > { %v827_v41 = vmul.f32 -1.442695, %v487_v39  ;;  %v900_v42 = vpop.f32.mrb[1].mxu1  ;;  %v477_v50 = vadd.f32 %v476_v40, %v335_v46 }
 0x112   : > { %1061 = vpow2.f32 %v826_v38 }
 0x113   : > { %1063 = vpow2.f32 %v827_v41 }
 0x11c   : > { %v1062_v43 = vpop.eup %1061 }
 0x11d   : > { %v484_v44 = vadd.f32 1.0, %v1062_v43  ;;  %v1064_v47 = vpop.eup %1063 }
 0x11e   : > { %v491_v49 = vadd.f32 1.0, %v1064_v47 }
 0x11f   : > { %1065 = vrcp.f32 %v484_v44 }
 0x120   : > { %1067 = vrcp.f32 %v491_v49 }
 0x129   : > { %v1066_v52 = vpop.eup %1065 }
 0x12a   : > { %v494_v55 = vmul.f32 %v1066_v52, %v477_v50  ;;  %v1068_v1 = vpop.eup %1067 }
 0x12b   : > { %v633_v57 = vpop.f32.mrb[2].mxu0  ;;  %v497_v5 = vsub.f32 1.0, %v1068_v1  ;;  %v499_v7 = vmul.f32 %v1068_v1, %v1316_v16 }
 0x12c   : > { %v495_v58 = vadd.f32 %v494_v55, %v269_v53  ;;  %v634_v9 = vadd.f32 %v633_v57, %v555_v51  ;;  %v635_v59 = vpop.f32.mrb[3].mxu0 }
 0x12d   : > { %v636_v60 = vadd.f32 %v635_v59, %v559_v54 }
 0x12e   : > { %1069 = vtanh.f32 %v495_v58  ;;  %v708_v61 = vadd.f32 %v634_v9, %v270_v56 }
 0x12f   : > { %v715_v0 = vadd.f32 %v636_v60, %v271_v62 }
 0x130   : > { %v828_v63 = vmul.f32 -1.442695, %v708_v61  ;;  %v704_v2 = vpop.f32.mrb[2].mxu1 }
 0x131   : > { %v829_v3 = vmul.f32 -1.442695, %v715_v0  ;;  %v935_v4 = vpop.f32.mrb[3].mxu1  ;;  %v705_v18 = vadd.f32 %v704_v2, %v563_v14 }
 0x132   : > { %1071 = vpow2.f32 %v828_v63 }
 0x133   : > { %1073 = vpow2.f32 %v829_v3 }
 0x138   : > { %v1070_v6 = vpop.eup %1069 }
 0x139   : > { %v498_v10 = vmul.f32 %v1070_v6, %v497_v5 }
 0x13b   : > { %v500_v11 = vadd.f32 %v499_v7, %v498_v10 }
 0x13c   : > { %v1072_v12 = vpop.eup %1071 }
 0x13d   : > { %729 = vst [vmem:[#allocation2] sm:$0xff] %v500_v11  ;;  %731 = vst [vmem:[%s1139_s28] sm:$0xff] %v500_v11  ;;  %v712_v13 = vadd.f32 1.0, %v1072_v12  ;;  %v1074_v15 = vpop.eup %1073 }
 0x13e   : > { %v719_v17 = vadd.f32 1.0, %v1074_v15 }
 0x13f   : > { %1075 = vrcp.f32 %v712_v13 }
 0x140   : > { %1077 = vrcp.f32 %v719_v17 }
 0x149   : > { %v1076_v19 = vpop.eup %1075 }
 0x14a   : > { %v722_v22 = vmul.f32 %v1076_v19, %v705_v18  ;;  %v1078_v16 = vpop.eup %1077 }
 0x14b   : > { %v725_v24 = vsub.f32 1.0, %v1078_v16  ;;  %v727_v26 = vmul.f32 %v1078_v16, %v1457_v20 }
 0x14c   : > { %v723_v23 = vadd.f32 %v722_v22, %v272_v21 }
 0x14e   : > { %1079 = vtanh.f32 %v723_v23 }
 0x158   : > { %v1080_v25 = vpop.eup %1079 }
 0x159   : > { %v726_v27 = vmul.f32 %v1080_v25, %v725_v24 }
 0x15b   : > { %v728_v28 = vadd.f32 %v727_v26, %v726_v27 }
 0x15d   : > { %730 = vst [vmem:[#allocation3] sm:$0xff] %v728_v28  ;;  %732 = vst [vmem:[%s1144_s7] sm:$0xff] %v728_v28 }
 0x15e PF: > { %s17_s21 = sadd.s32 1, %s1087_s21  }
 0x15f   : > { %p14_p5 = scmp.ge.s32.totalorder %s17_s21, 10  }
 0x161   :  { %16 = sbr.rel (!%p14_p5) target bundleno = 1 (0x1), region = 86 }

// kernel: retain_forward.3
= control target key start
LH: loop header
LB: loop body
LE: loop exit
PB: predicated region body
PF: predicated region fallthrough
CT: control target
= control target key end

     0   :  { %vm29_vm0 = vcmask 130048   ;;  %s1497_s1 = inlined_call_operand.vmem [shape: f32[16,128], index: 1, kind: input, shape index: {}]   ;;  %s1498_s0 = inlined_call_operand.vmem [shape: f32[64,16], index: 0, kind: input, shape index: {}]   ;;  %s1499_s2 = inlined_call_operand.vmem [shape: f32[128,768], index: 2, kind: input, shape index: {}]   ;;  %s1500_s4 = inlined_call_operand.vmem [shape: f32[64,128], index: 4, kind: output, shape index: {0}]   ;;  %s1501_s3 = inlined_call_operand.vmem [shape: f32[1,768], index: 3, kind: input, shape index: {}]   ;;  %s1502_s5 = inlined_call_operand.vmem [shape: f32[64,768], index: 5, kind: output, shape index: {1}]  }
   0x1   :  { %v27_v0 = vld [vmem:[%s1497_s1] sm:$0xff]  ;;  %v28_v1 = vld [vmem:[%s1497_s1 + $0x8] sm:$0xff]  ;;  %v21_v5 = vld [vmem:[%s1498_s0 + $0x10] sm:$0xff] }
   0x2   :  { %v19_v2 = vld [vmem:[%s1498_s0] sm:$0xff]  ;;  %v724_v3 = vpack.c.bf16 %v28_v1, %v27_v0  ;;  %v20_v4 = vld [vmem:[%s1498_s0 + $0x8] sm:$0xff]  ;;  %v174_v7 = vld [vmem:[%s1499_s2 + $0x38] sm:$0xff] }
   0x3   :  { %712 = vmatprep.mubr.msk.f32.mxu0 %vm29_vm0, %v19_v2  ;;  %v168_v6 = vld [vmem:[%s1499_s2 + $0x8] sm:$0xff]  ;;  %v167_v9 = vld [vmem:[%s1499_s2] sm:$0xff]  ;;  %v173_v10 = vld [vmem:[%s1499_s2 + $0x30] sm:$0xff] }
   0x4   :  { %725 = vmatprep.subr.bf16.mxu0 %v724_v3  ;;  %v728_v8 = vpack.c.bf16 %v174_v7, %v168_v6  ;;  %v170_v11 = vld [vmem:[%s1499_s2 + $0x18] sm:$0xff]  ;;  %v730_v12 = vpack.c.bf16 %v173_v10, %v167_v9  ;;  %v176_v13 = vld [vmem:[%s1499_s2 + $0x48] sm:$0xff]  ;;  %v169_v14 = vld [vmem:[%s1499_s2 + $0x10] sm:$0xff] }
   0x5   :  { %727 = vmatpush3.bf16.msra.mxu0 %v724_v3  ;;  %v175_v15 = vld [vmem:[%s1499_s2 + $0x40] sm:$0xff]  ;;  %v22_v16 = vld [vmem:[%s1498_s0 + $0x18] sm:$0xff]  ;;  %v760_v17 = vpack.c.bf16 %v176_v13, %v170_v11  ;;  %v180_v19 = vld [vmem:[%s1499_s2 + $0x68] sm:$0xff] }
   0x6   :  { %729 = vmatprep.subr.bf16.mxu1 %v728_v8  ;;  %v762_v18 = vpack.c.bf16 %v175_v15, %v169_v14  ;;  %v186_v20 = vld [vmem:[%s1499_s2 + $0x98] sm:$0xff]  ;;  %v179_v21 = vld [vmem:[%s1499_s2 + $0x60] sm:$0xff]  ;;  %v185_v24 = vld [vmem:[%s1499_s2 + $0x90] sm:$0xff] }
   0x7   :  { %v23_v22 = vld [vmem:[%s1498_s0 + $0x20] sm:$0xff]  ;;  %731 = vmatpush1.bf16.msra.mxu1 %v730_v12  ;;  %v732_v23 = vpack.c.bf16 %v186_v20, %v180_v19  ;;  %v182_v25 = vld [vmem:[%s1499_s2 + $0x78] sm:$0xff]  ;;  %v188_v26 = vld [vmem:[%s1499_s2 + $0xa8] sm:$0xff]  ;;  %761 = vmatprep.subr.bf16.mxu0 %v760_v17  ;;  %v734_v27 = vpack.c.bf16 %v185_v24, %v179_v21 }
   0x8   :  { %713 = vmatmul.mubr.msk.f32.vlgmr.msra.gmra.mrb[0].mxu0 %vm29_vm0, %v20_v4  ;;  %v764_v28 = vpack.c.bf16 %v188_v26, %v182_v25  ;;  %v181_v29 = vld [vmem:[%s1499_s2 + $0x70] sm:$0xff]  ;;  %v187_v30 = vld [vmem:[%s1499_s2 + $0xa0] sm:$0xff]  ;;  %v192_v31 = vld [vmem:[%s1499_s2 + $0xc8] sm:$0xff] }
   0x9   :  { %715 = vmatprep.mubr.msk.f32.mxu0 %vm29_vm0, %v21_v5  ;;  %763 = vmatpush1.bf16.msra.mxu0 %v762_v18  ;;  %v766_v32 = vpack.c.bf16 %v187_v30, %v181_v29  ;;  %v198_v33 = vld [vmem:[%s1499_s2 + $0xf8] sm:$0xff]  ;;  %v191_v34 = vld [vmem:[%s1499_s2 + $0xc0] sm:$0xff]  ;;  %v197_v35 = vld [vmem:[%s1499_s2 + $0xf0] sm:$0xff] }
   0xa   :  { %733 = vmatprep.subr.bf16.mxu1 %v732_v23  ;;  %v24_v36 = vld [vmem:[%s1498_s0 + $0x28] sm:$0xff]  ;;  %765 = vmatprep.subr.bf16.mxu0 %v764_v28  ;;  %v736_v37 = vpack.c.bf16 %v198_v33, %v192_v31  ;;  %v194_v38 = vld [vmem:[%s1499_s2 + $0xd8] sm:$0xff]  ;;  %v193_v40 = vld [vmem:[%s1499_s2 + $0xd0] sm:$0xff]  ;;  %v738_v41 = vpack.c.bf16 %v197_v35, %v191_v34 }
   0xb   :  { %v200_v39 = vld [vmem:[%s1499_s2 + $0x108] sm:$0xff]  ;;  %735 = vmatpush1.bf16.msra.mxu1 %v734_v27  ;;  %v199_v43 = vld [vmem:[%s1499_s2 + $0x100] sm:$0xff]  ;;  %v210_v45 = vld [vmem:[%s1499_s2 + $0x158] sm:$0xff] }
   0xc   :  { %716 = vmatmul.mubr.msk.f32.gmra.mrb[2].mxu0 %vm29_vm0, %v22_v16  ;;  %v768_v42 = vpack.c.bf16 %v200_v39, %v194_v38  ;;  %v204_v44 = vld [vmem:[%s1499_s2 + $0x128] sm:$0xff]  ;;  %737 = vmatprep.subr.bf16.mxu1 %v736_v37  ;;  %v203_v47 = vld [vmem:[%s1499_s2 + $0x120] sm:$0xff]  ;;  %v209_v48 = vld [vmem:[%s1499_s2 + $0x150] sm:$0xff]  ;;  %v770_v51 = vpack.c.bf16 %v199_v43, %v193_v40 }
   0xd   :  { %718 = vmatprep.mubr.msk.f32.mxu0 %vm29_vm0, %v23_v22  ;;  %v740_v46 = vpack.c.bf16 %v210_v45, %v204_v44  ;;  %v206_v49 = vld [vmem:[%s1499_s2 + $0x138] sm:$0xff]  ;;  %v25_v50 = vld [vmem:[%s1498_s0 + $0x30] sm:$0xff]  ;;  %767 = vmatpush1.bf16.msra.mxu0 %v766_v32  ;;  %v212_v52 = vld [vmem:[%s1499_s2 + $0x168] sm:$0xff]  ;;  %v742_v58 = vpack.c.bf16 %v209_v48, %v203_v47 }
   0xe   :  { %v205_v53 = vld [vmem:[%s1499_s2 + $0x130] sm:$0xff]  ;;  %769 = vmatprep.subr.bf16.mxu0 %v768_v42  ;;  %v772_v54 = vpack.c.bf16 %v212_v52, %v206_v49  ;;  %v211_v55 = vld [vmem:[%s1499_s2 + $0x160] sm:$0xff]  ;;  %v216_v56 = vld [vmem:[%s1499_s2 + $0x188] sm:$0xff] }
   0xf   :  { %v222_v57 = vld [vmem:[%s1499_s2 + $0x1b8] sm:$0xff]  ;;  %739 = vmatpush1.bf16.msra.mxu1 %v738_v41  ;;  %v224_v60 = vld [vmem:[%s1499_s2 + $0x1c8] sm:$0xff]  ;;  %v215_v63 = vld [vmem:[%s1499_s2 + $0x180] sm:$0xff]  ;;  %v774_v1 = vpack.c.bf16 %v211_v55, %v205_v53 }
  0x10   :  { %719 = vmatmul.mubr.msk.f32.gmra.mrb[4].mxu0 %vm29_vm0, %v24_v36  ;;  %v218_v59 = vld [vmem:[%s1499_s2 + $0x198] sm:$0xff]  ;;  %741 = vmatprep.subr.bf16.mxu1 %v740_v46  ;;  %v744_v62 = vpack.c.bf16 %v222_v57, %v216_v56  ;;  %v221_v0 = vld [vmem:[%s1499_s2 + $0x1b0] sm:$0xff]  ;;  %v228_v2 = vld [vmem:[%s1499_s2 + $0x1e8] sm:$0xff]  ;;  %v841_v46 = vmov 0.0  }
  0x11   :  { %721 = vmatprep.mubr.msk.f32.mxu0 %vm29_vm0, %v25_v50  ;;  %v26_v61 = vld [vmem:[%s1498_s0 + $0x38] sm:$0xff]  ;;  %771 = vmatpush1.bf16.msra.mxu0 %v770_v51  ;;  %v776_v4 = vpack.c.bf16 %v224_v60, %v218_v59  ;;  %v217_v5 = vld [vmem:[%s1499_s2 + $0x190] sm:$0xff]  ;;  %v223_v6 = vld [vmem:[%s1499_s2 + $0x1c0] sm:$0xff]  ;;  %v746_v7 = vpack.c.bf16 %v221_v0, %v215_v63 }
  0x12   :  { %v234_v3 = vld [vmem:[%s1499_s2 + $0x218] sm:$0xff]  ;;  %773 = vmatprep.subr.bf16.mxu0 %v772_v54  ;;  %v236_v9 = vld [vmem:[%s1499_s2 + $0x228] sm:$0xff]  ;;  %v227_v11 = vld [vmem:[%s1499_s2 + $0x1e0] sm:$0xff]  ;;  %v778_v13 = vpack.c.bf16 %v223_v6, %v217_v5  ;;  %359 = vmatprep.mubr.f32.mxu1 %v841_v46 }
  0x13   :  { %743 = vmatpush1.bf16.msra.mxu1 %v742_v58  ;;  %v230_v8 = vld [vmem:[%s1499_s2 + $0x1f8] sm:$0xff]  ;;  %v748_v10 = vpack.c.bf16 %v234_v3, %v228_v2  ;;  %v233_v12 = vld [vmem:[%s1499_s2 + $0x210] sm:$0xff]  ;;  %v240_v14 = vld [vmem:[%s1499_s2 + $0x248] sm:$0xff] }
  0x14   :  { %722 = vmatmul.mubr.msk.f32.gmra.mrb[6].mxu0 %vm29_vm0, %v26_v61  ;;  %745 = vmatprep.subr.bf16.mxu1 %v744_v62  ;;  %v246_v15 = vld [vmem:[%s1499_s2 + $0x278] sm:$0xff]  ;;  %v780_v16 = vpack.c.bf16 %v236_v9, %v230_v8  ;;  %v229_v17 = vld [vmem:[%s1499_s2 + $0x1f0] sm:$0xff]  ;;  %v235_v18 = vld [vmem:[%s1499_s2 + $0x220] sm:$0xff]  ;;  %v750_v19 = vpack.c.bf16 %v233_v12, %v227_v11 }
  0x15   :  { %775 = vmatpush1.bf16.msra.mxu0 %v774_v1  ;;  %v242_v20 = vld [vmem:[%s1499_s2 + $0x258] sm:$0xff]  ;;  %v248_v21 = vld [vmem:[%s1499_s2 + $0x288] sm:$0xff]  ;;  %v752_v22 = vpack.c.bf16 %v246_v15, %v240_v14  ;;  %v239_v23 = vld [vmem:[%s1499_s2 + $0x240] sm:$0xff]  ;;  %v782_v25 = vpack.c.bf16 %v235_v18, %v229_v17  ;;  %472 = vmatprep.mubr.f32.mxu0 %v841_v46 }
  0x16   :  { %777 = vmatprep.subr.bf16.mxu0 %v776_v4  ;;  %v245_v24 = vld [vmem:[%s1499_s2 + $0x270] sm:$0xff]  ;;  %v252_v26 = vld [vmem:[%s1499_s2 + $0x2a8] sm:$0xff]  ;;  %v258_v27 = vld [vmem:[%s1499_s2 + $0x2d8] sm:$0xff]  ;;  %v784_v28 = vpack.c.bf16 %v248_v21, %v242_v20 }
  0x17   :  { %747 = vmatpush1.bf16.msra.mxu1 %v746_v7  ;;  %v241_v29 = vld [vmem:[%s1499_s2 + $0x250] sm:$0xff]  ;;  %v247_v30 = vld [vmem:[%s1499_s2 + $0x280] sm:$0xff]  ;;  %v754_v31 = vpack.c.bf16 %v245_v24, %v239_v23  ;;  %v254_v32 = vld [vmem:[%s1499_s2 + $0x2b8] sm:$0xff]  ;;  %v756_v34 = vpack.c.bf16 %v258_v27, %v252_v26 }
  0x18   :  { %749 = vmatprep.subr.bf16.mxu1 %v748_v10  ;;  %v260_v33 = vld [vmem:[%s1499_s2 + $0x2e8] sm:$0xff]  ;;  %v251_v35 = vld [vmem:[%s1499_s2 + $0x2a0] sm:$0xff]  ;;  %v257_v36 = vld [vmem:[%s1499_s2 + $0x2d0] sm:$0xff]  ;;  %v786_v37 = vpack.c.bf16 %v247_v30, %v241_v29 }
  0x19   :  { %779 = vmatpush1.bf16.msra.mxu0 %v778_v13  ;;  %v788_v38 = vpack.c.bf16 %v260_v33, %v254_v32  ;;  %v253_v39 = vld [vmem:[%s1499_s2 + $0x2b0] sm:$0xff]  ;;  %v259_v40 = vld [vmem:[%s1499_s2 + $0x2e0] sm:$0xff]  ;;  %v758_v41 = vpack.c.bf16 %v257_v36, %v251_v35  ;;  %v172_v43 = vld [vmem:[%s1499_s2 + $0x28] sm:$0xff]  ;;  %v265_v36 = vlaneseq }
  0x1a   :  { %781 = vmatprep.subr.bf16.mxu0 %v780_v16  ;;  %v790_v42 = vpack.c.bf16 %v259_v40, %v253_v39  ;;  %v178_v44 = vld [vmem:[%s1499_s2 + $0x58] sm:$0xff]  ;;  %v171_v47 = vld [vmem:[%s1499_s2 + $0x20] sm:$0xff]  ;;  %v177_v48 = vld [vmem:[%s1499_s2 + $0x50] sm:$0xff] }
  0x1b   :  { %751 = vmatpush1.bf16.msra.mxu1 %v750_v19  ;;  %v792_v45 = vpack.c.bf16 %v178_v44, %v172_v43  ;;  %v184_v49 = vld [vmem:[%s1499_s2 + $0x88] sm:$0xff]  ;;  %v190_v50 = vld [vmem:[%s1499_s2 + $0xb8] sm:$0xff]  ;;  %v794_v51 = vpack.c.bf16 %v177_v48, %v171_v47  ;;  %v183_v53 = vld [vmem:[%s1499_s2 + $0x80] sm:$0xff] }
  0x1c   :  { %753 = vmatprep.subr.bf16.mxu1 %v752_v22  ;;  %v189_v54 = vld [vmem:[%s1499_s2 + $0xb0] sm:$0xff]  ;;  %v796_v56 = vpack.c.bf16 %v190_v50, %v184_v49  ;;  %v196_v57 = vld [vmem:[%s1499_s2 + $0xe8] sm:$0xff]  ;;  %v202_v58 = vld [vmem:[%s1499_s2 + $0x118] sm:$0xff] }
  0x1d   :  { %783 = vmatpush1.bf16.msra.mxu0 %v782_v25  ;;  %v798_v59 = vpack.c.bf16 %v189_v54, %v183_v53  ;;  %v195_v61 = vld [vmem:[%s1499_s2 + $0xe0] sm:$0xff]  ;;  %v201_v62 = vld [vmem:[%s1499_s2 + $0x110] sm:$0xff]  ;;  %v800_v0 = vpack.c.bf16 %v202_v58, %v196_v57  ;;  %v208_v1 = vld [vmem:[%s1499_s2 + $0x148] sm:$0xff] }
  0x1e   :  { %785 = vmatprep.subr.bf16.mxu0 %v784_v28  ;;  %v214_v2 = vld [vmem:[%s1499_s2 + $0x178] sm:$0xff]  ;;  %v802_v3 = vpack.c.bf16 %v201_v62, %v195_v61  ;;  %v207_v4 = vld [vmem:[%s1499_s2 + $0x140] sm:$0xff]  ;;  %v213_v5 = vld [vmem:[%s1499_s2 + $0x170] sm:$0xff] }
  0x1f   :  { %755 = vmatpush1.bf16.msra.mxu1 %v754_v31  ;;  %v804_v7 = vpack.c.bf16 %v214_v2, %v208_v1  ;;  %v220_v9 = vld [vmem:[%s1499_s2 + $0x1a8] sm:$0xff]  ;;  %v226_v10 = vld [vmem:[%s1499_s2 + $0x1d8] sm:$0xff]  ;;  %v806_v11 = vpack.c.bf16 %v213_v5, %v207_v4  ;;  %v219_v12 = vld [vmem:[%s1499_s2 + $0x1a0] sm:$0xff] }
  0x20   :  { %757 = vmatprep.subr.bf16.mxu1 %v756_v34  ;;  %v225_v13 = vld [vmem:[%s1499_s2 + $0x1d0] sm:$0xff]  ;;  %v808_v15 = vpack.c.bf16 %v226_v10, %v220_v9  ;;  %v232_v17 = vld [vmem:[%s1499_s2 + $0x208] sm:$0xff]  ;;  %v238_v18 = vld [vmem:[%s1499_s2 + $0x238] sm:$0xff] }
  0x21   :  { %787 = vmatpush1.bf16.msra.mxu0 %v786_v37  ;;  %v810_v19 = vpack.c.bf16 %v225_v13, %v219_v12  ;;  %v231_v20 = vld [vmem:[%s1499_s2 + $0x200] sm:$0xff]  ;;  %v237_v21 = vld [vmem:[%s1499_s2 + $0x230] sm:$0xff]  ;;  %v812_v22 = vpack.c.bf16 %v238_v18, %v232_v17  ;;  %v244_v23 = vld [vmem:[%s1499_s2 + $0x268] sm:$0xff]  ;;  %v1294_v37 = vshrl.u32 %v265_v36, 7 }
  0x22   :  { %789 = vmatprep.subr.bf16.mxu0 %v788_v38  ;;  %v250_v24 = vld [vmem:[%s1499_s2 + $0x298] sm:$0xff]  ;;  %v814_v25 = vpack.c.bf16 %v237_v21, %v231_v20  ;;  %v243_v26 = vld [vmem:[%s1499_s2 + $0x260] sm:$0xff]  ;;  %v249_v27 = vld [vmem:[%s1499_s2 + $0x290] sm:$0xff] }
  0x23   :  { %759 = vmatpush1.bf16.msra.mxu1 %v758_v41  ;;  %v816_v28 = vpack.c.bf16 %v250_v24, %v244_v23  ;;  %v256_v29 = vld [vmem:[%s1499_s2 + $0x2c8] sm:$0xff]  ;;  %v262_v30 = vld [vmem:[%s1499_s2 + $0x2f8] sm:$0xff]  ;;  %v818_v31 = vpack.c.bf16 %v249_v27, %v243_v26  ;;  %v255_v32 = vld [vmem:[%s1499_s2 + $0x2c0] sm:$0xff]  ;;  %v267_v38 = vsub.s32 0, %v1294_v37  ;;  %v275_v39 = vsub.s32 2, %v1294_v37 }
  0x24   :  { %824 = vmatprep.subr.bf16.mxu1 %v792_v45  ;;  %v261_v33 = vld [vmem:[%s1499_s2 + $0x2f0] sm:$0xff]  ;;  %v820_v34 = vpack.c.bf16 %v262_v30, %v256_v29  ;;  %v1301_v40 = vld [vmem:[%s1501_s3] sm:$0x3f]  ;;  %v271_v41 = vsub.s32 1, %v1294_v37 }
  0x25   :  { %791 = vmatpush1.bf16.msra.mxu0 %v790_v42  ;;  %v822_v35 = vpack.c.bf16 %v261_v33, %v255_v32  ;;  %v279_v42 = vsub.s32 3, %v1294_v37  ;;  %v1306_v43 = vrot.slane %v1301_v40, %v267_v38  ;;  %v1309_v44 = vrot.slane %v1301_v40, %v275_v39 }
  0x26   :  { %793 = vmatprep.subr.bf16.mxu0 %v792_v45  ;;  %v1312_v45 = vrot.slane %v1301_v40, %v271_v41  ;;  %v283_v38 = vsub.s32 4, %v1294_v37 }
  0xdb   :  { %v1122_v52 = vpop.f32.mrb[0].mxu0 }
  0xdc   :  { %160 = vst [vmem:[%s1500_s4 + $0x8] sm:$0xff] %v1122_v52  ;;  %v1134_v55 = vpop.f32.mrb[1].mxu0 }
  0xdd   :  { %159 = vst [vmem:[%s1500_s4] sm:$0xff] %v1134_v55  ;;  %360 = vmatmul.mubr.f32.vlgmr.msra.gmra.mrb[0].mxu1 %v1134_v55  ;;  %473 = vmatmul.mubr.f32.vlgmr.msra.gmra.mrb[8].mxu0 %v1134_v55 }
  0xde   :  { %832 = vmatpush1.bf16.msra.mxu1 %v794_v51  ;;  %795 = vmatpush1.bf16.msra.mxu0 %v794_v51 }
  0xdf   :  { %365 = vmatprep.mubr.f32.mxu1 %v841_v46  ;;  %478 = vmatprep.mubr.f32.mxu0 %v841_v46  ;;  %v1150_v60 = vpop.f32.mrb[2].mxu0 }
  0xe0   :  { %825 = vmatprep.subr.bf16.mxu1 %v796_v56  ;;  %797 = vmatprep.subr.bf16.mxu0 %v796_v56  ;;  %162 = vst [vmem:[%s1500_s4 + $0x18] sm:$0xff] %v1150_v60  ;;  %v1162_v63 = vpop.f32.mrb[3].mxu0 }
  0xe1   :  { %366 = vmatmul.mubr.f32.gmra.mrb[2].mxu1 %v1122_v52  ;;  %479 = vmatmul.mubr.f32.gmra.mrb[10].mxu0 %v1122_v52  ;;  %161 = vst [vmem:[%s1500_s4 + $0x10] sm:$0xff] %v1162_v63 }
  0xe2   :  { %833 = vmatpush1.bf16.msra.mxu1 %v798_v59  ;;  %799 = vmatpush1.bf16.msra.mxu0 %v798_v59 }
  0xe3   :  { %371 = vmatprep.mubr.f32.mxu1 %v841_v46  ;;  %484 = vmatprep.mubr.f32.mxu0 %v841_v46  ;;  %v1184_v6 = vpop.f32.mrb[4].mxu0 }
  0xe4   :  { %826 = vmatprep.subr.bf16.mxu1 %v800_v0  ;;  %801 = vmatprep.subr.bf16.mxu0 %v800_v0  ;;  %164 = vst [vmem:[%s1500_s4 + $0x28] sm:$0xff] %v1184_v6  ;;  %v1190_v8 = vpop.f32.mrb[5].mxu0 }
  0xe5   :  { %372 = vmatmul.mubr.f32.gmra.mrb[4].mxu1 %v1162_v63  ;;  %485 = vmatmul.mubr.f32.gmra.mrb[12].mxu0 %v1162_v63  ;;  %163 = vst [vmem:[%s1500_s4 + $0x20] sm:$0xff] %v1190_v8 }
  0xe6   :  { %834 = vmatpush1.bf16.msra.mxu1 %v802_v3  ;;  %803 = vmatpush1.bf16.msra.mxu0 %v802_v3 }
  0xe7   :  { %377 = vmatprep.mubr.f32.mxu1 %v841_v46  ;;  %490 = vmatprep.mubr.f32.mxu0 %v841_v46  ;;  %v1212_v14 = vpop.f32.mrb[6].mxu0 }
  0xe8   :  { %827 = vmatprep.subr.bf16.mxu1 %v804_v7  ;;  %805 = vmatprep.subr.bf16.mxu0 %v804_v7  ;;  %166 = vst [vmem:[%s1500_s4 + $0x38] sm:$0xff] %v1212_v14  ;;  %v1218_v16 = vpop.f32.mrb[7].mxu0 }
  0xe9   :  { %378 = vmatmul.mubr.f32.gmra.mrb[6].mxu1 %v1150_v60  ;;  %491 = vmatmul.mubr.f32.gmra.mrb[14].mxu0 %v1150_v60  ;;  %165 = vst [vmem:[%s1500_s4 + $0x30] sm:$0xff] %v1218_v16 }
  0xea   :  { %835 = vmatpush1.bf16.msra.mxu1 %v806_v11  ;;  %807 = vmatpush1.bf16.msra.mxu0 %v806_v11 }
  0xeb   :  { %383 = vmatprep.mubr.f32.mxu1 %v841_v46  ;;  %496 = vmatprep.mubr.f32.mxu0 %v841_v46 }
  0xec   :  { %828 = vmatprep.subr.bf16.mxu1 %v808_v15  ;;  %809 = vmatprep.subr.bf16.mxu0 %v808_v15 }
  0xed   :  { %384 = vmatmul.mubr.f32.gmra.mrb[8].mxu1 %v1190_v8  ;;  %497 = vmatmul.mubr.f32.gmra.mrb[16].mxu0 %v1190_v8 }
  0xee   :  { %836 = vmatpush1.bf16.msra.mxu1 %v810_v19  ;;  %811 = vmatpush1.bf16.msra.mxu0 %v810_v19 }
  0xef   :  { %389 = vmatprep.mubr.f32.mxu1 %v841_v46  ;;  %502 = vmatprep.mubr.f32.mxu0 %v841_v46 }
  0xf0   :  { %829 = vmatprep.subr.bf16.mxu1 %v812_v22  ;;  %813 = vmatprep.subr.bf16.mxu0 %v812_v22 }
  0xf1   :  { %390 = vmatmul.mubr.f32.gmra.mrb[10].mxu1 %v1184_v6  ;;  %503 = vmatmul.mubr.f32.gmra.mrb[18].mxu0 %v1184_v6 }
  0xf2   :  { %837 = vmatpush1.bf16.msra.mxu1 %v814_v25  ;;  %815 = vmatpush1.bf16.msra.mxu0 %v814_v25 }
  0xf3   :  { %395 = vmatprep.mubr.f32.mxu1 %v841_v46  ;;  %508 = vmatprep.mubr.f32.mxu0 %v841_v46 }
  0xf4   :  { %830 = vmatprep.subr.bf16.mxu1 %v816_v28  ;;  %817 = vmatprep.subr.bf16.mxu0 %v816_v28 }
  0xf5   :  { %396 = vmatmul.mubr.f32.gmra.mrb[12].mxu1 %v1218_v16  ;;  %509 = vmatmul.mubr.f32.gmra.mrb[20].mxu0 %v1218_v16 }
  0xf6   :  { %838 = vmatpush1.bf16.msra.mxu1 %v818_v31  ;;  %819 = vmatpush1.bf16.msra.mxu0 %v818_v31 }
  0xf7   :  { %401 = vmatprep.mubr.f32.mxu1 %v841_v46  ;;  %514 = vmatprep.mubr.f32.mxu0 %v841_v46 }
  0xf8   :  { %831 = vmatprep.subr.bf16.mxu1 %v820_v34  ;;  %821 = vmatprep.subr.bf16.mxu0 %v820_v34 }
  0xf9   :  { %402 = vmatmul.mubr.f32.gmra.mrb[14].mxu1 %v1212_v14  ;;  %515 = vmatmul.mubr.f32.gmra.mrb[22].mxu0 %v1212_v14 }
  0xfa   :  { %839 = vmatpush1.bf16.msra.mxu1 %v822_v35  ;;  %823 = vmatpush1.bf16.msra.mxu0 %v822_v35 }
  0xfb   :  { %585 = vmatprep.mubr.f32.mxu0 %v841_v46  ;;  %603 = vmatprep.mubr.f32.mxu1 %v841_v46 }
  0xfd   :  { %586 = vmatmul.mubr.f32.vlgmr.msra.gmra.mrb[24].mxu0 %v1134_v55  ;;  %604 = vmatmul.mubr.f32.vlgmr.msra.gmra.mrb[16].mxu1 %v1150_v60 }
  0xfe   :  { %591 = vmatprep.mubr.f32.mxu0 %v841_v46  ;;  %609 = vmatprep.mubr.f32.mxu1 %v841_v46 }
 0x101   :  { %592 = vmatmul.mubr.f32.gmra.mrb[26].mxu0 %v1122_v52  ;;  %610 = vmatmul.mubr.f32.gmra.mrb[18].mxu1 %v1190_v8 }
 0x102   :  { %597 = vmatprep.mubr.f32.mxu0 %v841_v46  ;;  %615 = vmatprep.mubr.f32.mxu1 %v841_v46 }
 0x105   :  { %598 = vmatmul.mubr.f32.gmra.mrb[28].mxu0 %v1162_v63  ;;  %616 = vmatmul.mubr.f32.gmra.mrb[20].mxu1 %v1184_v6 }
 0x106   :  { %621 = vmatprep.mubr.f32.mxu1 %v841_v46 }
 0x109   :  { %622 = vmatmul.mubr.f32.gmra.mrb[22].mxu1 %v1218_v16 }
 0x10a   :  { %627 = vmatprep.mubr.f32.mxu1 %v841_v46  ;;  %v1315_v46 = vrot.slane %v1301_v40, %v279_v42  ;;  %v287_v42 = vsub.s32 5, %v1294_v37 }
 0x10d   :  { %628 = vmatmul.mubr.f32.gmra.mrb[24].mxu1 %v1212_v14 }
 0x1b0   :  { %v361_v47 = vpop.f32.mrb[0].mxu1  ;;  %v474_v48 = vpop.f32.mrb[8].mxu0 }
 0x1b1   :  { %v362_v49 = vadd.f32 %v361_v47, %v1306_v43  ;;  %v475_v50 = vadd.f32 %v474_v48, %v1309_v44  ;;  %v363_v51 = vpop.f32.mrb[1].mxu1  ;;  %v476_v52 = vpop.f32.mrb[9].mxu0 }
 0x1b2   :  { %v364_v53 = vadd.f32 %v363_v51, %v1312_v45  ;;  %v477_v54 = vadd.f32 %v476_v52, %v1315_v46  ;;  %v284_v52 = vrot.slane %v1301_v40, %v283_v38 }
 0x1b3   :  { %634 = vst [vmem:[%s1502_s5] sm:$0xff] %v362_v49  ;;  %636 = vst [vmem:[%s1502_s5 + $0x10] sm:$0xff] %v475_v50 }
 0x1b4   :  { %635 = vst [vmem:[%s1502_s5 + $0x8] sm:$0xff] %v364_v53  ;;  %637 = vst [vmem:[%s1502_s5 + $0x18] sm:$0xff] %v477_v54  ;;  %v367_v55 = vpop.f32.mrb[2].mxu1  ;;  %v480_v56 = vpop.f32.mrb[10].mxu0 }
 0x1b5   :  { %v368_v57 = vadd.f32 %v367_v55, %v1306_v43  ;;  %v481_v58 = vadd.f32 %v480_v56, %v1309_v44  ;;  %v369_v59 = vpop.f32.mrb[3].mxu1  ;;  %v482_v60 = vpop.f32.mrb[11].mxu0  ;;  %v288_v55 = vrot.slane %v1301_v40, %v287_v42 }
 0x1b6   :  { %v370_v61 = vadd.f32 %v369_v59, %v1312_v45  ;;  %v483_v62 = vadd.f32 %v482_v60, %v1315_v46 }
 0x1b7   :  { %640 = vst [vmem:[%s1502_s5 + $0x30] sm:$0xff] %v368_v57  ;;  %642 = vst [vmem:[%s1502_s5 + $0x40] sm:$0xff] %v481_v58 }
 0x1b8   :  { %641 = vst [vmem:[%s1502_s5 + $0x38] sm:$0xff] %v370_v61  ;;  %643 = vst [vmem:[%s1502_s5 + $0x48] sm:$0xff] %v483_v62  ;;  %v373_v63 = vpop.f32.mrb[4].mxu1  ;;  %v486_v0 = vpop.f32.mrb[12].mxu0 }
 0x1b9   :  { %v374_v1 = vadd.f32 %v373_v63, %v1306_v43  ;;  %v487_v2 = vadd.f32 %v486_v0, %v1309_v44  ;;  %v375_v3 = vpop.f32.mrb[5].mxu1  ;;  %v488_v4 = vpop.f32.mrb[13].mxu0 }
 0x1ba   :  { %v376_v5 = vadd.f32 %v375_v3, %v1312_v45  ;;  %v489_v6 = vadd.f32 %v488_v4, %v1315_v46 }
 0x1bb   :  { %646 = vst [vmem:[%s1502_s5 + $0x60] sm:$0xff] %v374_v1  ;;  %648 = vst [vmem:[%s1502_s5 + $0x70] sm:$0xff] %v487_v2 }
 0x1bc   :  { %647 = vst [vmem:[%s1502_s5 + $0x68] sm:$0xff] %v376_v5  ;;  %649 = vst [vmem:[%s1502_s5 + $0x78] sm:$0xff] %v489_v6  ;;  %v379_v7 = vpop.f32.mrb[6].mxu1  ;;  %v492_v8 = vpop.f32.mrb[14].mxu0 }
 0x1bd   :  { %v380_v9 = vadd.f32 %v379_v7, %v1306_v43  ;;  %v493_v10 = vadd.f32 %v492_v8, %v1309_v44  ;;  %v381_v11 = vpop.f32.mrb[7].mxu1  ;;  %v494_v12 = vpop.f32.mrb[15].mxu0 }
 0x1be   :  { %v382_v13 = vadd.f32 %v381_v11, %v1312_v45  ;;  %v495_v14 = vadd.f32 %v494_v12, %v1315_v46 }
 0x1bf   :  { %652 = vst [vmem:[%s1502_s5 + $0x90] sm:$0xff] %v380_v9  ;;  %654 = vst [vmem:[%s1502_s5 + $0xa0] sm:$0xff] %v493_v10 }
 0x1c0   :  { %653 = vst [vmem:[%s1502_s5 + $0x98] sm:$0xff] %v382_v13  ;;  %655 = vst [vmem:[%s1502_s5 + $0xa8] sm:$0xff] %v495_v14  ;;  %v385_v15 = vpop.f32.mrb[8].mxu1  ;;  %v498_v16 = vpop.f32.mrb[16].mxu0 }
 0x1c1   :  { %v386_v17 = vadd.f32 %v385_v15, %v1306_v43  ;;  %v499_v18 = vadd.f32 %v498_v16, %v1309_v44  ;;  %v387_v19 = vpop.f32.mrb[9].mxu1  ;;  %v500_v20 = vpop.f32.mrb[17].mxu0 }
 0x1c2   :  { %v388_v21 = vadd.f32 %v387_v19, %v1312_v45  ;;  %v501_v22 = vadd.f32 %v500_v20, %v1315_v46 }
 0x1c3   :  { %658 = vst [vmem:[%s1502_s5 + $0xc0] sm:$0xff] %v386_v17  ;;  %660 = vst [vmem:[%s1502_s5 + $0xd0] sm:$0xff] %v499_v18 }
 0x1c4   :  { %659 = vst [vmem:[%s1502_s5 + $0xc8] sm:$0xff] %v388_v21  ;;  %661 = vst [vmem:[%s1502_s5 + $0xd8] sm:$0xff] %v501_v22  ;;  %v391_v23 = vpop.f32.mrb[10].mxu1  ;;  %v504_v24 = vpop.f32.mrb[18].mxu0 }
 0x1c5   :  { %v392_v25 = vadd.f32 %v391_v23, %v1306_v43  ;;  %v505_v26 = vadd.f32 %v504_v24, %v1309_v44  ;;  %v393_v27 = vpop.f32.mrb[11].mxu1  ;;  %v506_v28 = vpop.f32.mrb[19].mxu0 }
 0x1c6   :  { %v394_v29 = vadd.f32 %v393_v27, %v1312_v45  ;;  %v507_v30 = vadd.f32 %v506_v28, %v1315_v46 }
 0x1c7   :  { %664 = vst [vmem:[%s1502_s5 + $0xf0] sm:$0xff] %v392_v25  ;;  %666 = vst [vmem:[%s1502_s5 + $0x100] sm:$0xff] %v505_v26 }
 0x1c8   :  { %665 = vst [vmem:[%s1502_s5 + $0xf8] sm:$0xff] %v394_v29  ;;  %667 = vst [vmem:[%s1502_s5 + $0x108] sm:$0xff] %v507_v30  ;;  %v397_v31 = vpop.f32.mrb[12].mxu1  ;;  %v510_v32 = vpop.f32.mrb[20].mxu0 }
 0x1c9   :  { %v398_v33 = vadd.f32 %v397_v31, %v1306_v43  ;;  %v511_v34 = vadd.f32 %v510_v32, %v1309_v44  ;;  %v399_v35 = vpop.f32.mrb[13].mxu1  ;;  %v512_v36 = vpop.f32.mrb[21].mxu0 }
 0x1ca   :  { %v400_v39 = vadd.f32 %v399_v35, %v1312_v45  ;;  %v513_v41 = vadd.f32 %v512_v36, %v1315_v46 }
 0x1cb   :  { %670 = vst [vmem:[%s1502_s5 + $0x120] sm:$0xff] %v398_v33  ;;  %672 = vst [vmem:[%s1502_s5 + $0x130] sm:$0xff] %v511_v34 }
 0x1cc   :  { %671 = vst [vmem:[%s1502_s5 + $0x128] sm:$0xff] %v400_v39  ;;  %673 = vst [vmem:[%s1502_s5 + $0x138] sm:$0xff] %v513_v41  ;;  %v403_v47 = vpop.f32.mrb[14].mxu1  ;;  %v516_v48 = vpop.f32.mrb[22].mxu0 }
 0x1cd   :  { %v404_v37 = vadd.f32 %v403_v47, %v1306_v43  ;;  %v517_v49 = vadd.f32 %v516_v48, %v1309_v44  ;;  %v405_v50 = vpop.f32.mrb[15].mxu1  ;;  %v518_v51 = vpop.f32.mrb[23].mxu0 }
 0x1ce   :  { %v406_v53 = vadd.f32 %v405_v50, %v1312_v45  ;;  %v519_v54 = vadd.f32 %v518_v51, %v1315_v46 }
 0x1cf   :  { %676 = vst [vmem:[%s1502_s5 + $0x150] sm:$0xff] %v404_v37  ;;  %678 = vst [vmem:[%s1502_s5 + $0x160] sm:$0xff] %v517_v49 }
 0x1d0   :  { %677 = vst [vmem:[%s1502_s5 + $0x158] sm:$0xff] %v406_v53  ;;  %679 = vst [vmem:[%s1502_s5 + $0x168] sm:$0xff] %v519_v54  ;;  %v587_v43 = vpop.f32.mrb[24].mxu0  ;;  %v605_v44 = vpop.f32.mrb[16].mxu1 }
 0x1d1   :  { %v588_v45 = vadd.f32 %v587_v43, %v284_v52  ;;  %v606_v40 = vadd.f32 %v605_v44, %v284_v52  ;;  %v589_v46 = vpop.f32.mrb[25].mxu0  ;;  %v607_v56 = vpop.f32.mrb[17].mxu1 }
 0x1d2   :  { %v590_v57 = vadd.f32 %v589_v46, %v288_v55  ;;  %v608_v58 = vadd.f32 %v607_v56, %v288_v55 }
 0x1d3   :  { %638 = vst [vmem:[%s1502_s5 + $0x20] sm:$0xff] %v588_v45  ;;  %656 = vst [vmem:[%s1502_s5 + $0xb0] sm:$0xff] %v606_v40 }
 0x1d4   :  { %639 = vst [vmem:[%s1502_s5 + $0x28] sm:$0xff] %v590_v57  ;;  %657 = vst [vmem:[%s1502_s5 + $0xb8] sm:$0xff] %v608_v58  ;;  %v593_v59 = vpop.f32.mrb[26].mxu0  ;;  %v611_v60 = vpop.f32.mrb[18].mxu1 }
 0x1d5   :  { %v594_v61 = vadd.f32 %v593_v59, %v284_v52  ;;  %v612_v62 = vadd.f32 %v611_v60, %v284_v52  ;;  %v595_v63 = vpop.f32.mrb[27].mxu0  ;;  %v613_v0 = vpop.f32.mrb[19].mxu1 }
 0x1d6   :  { %v596_v1 = vadd.f32 %v595_v63, %v288_v55  ;;  %v614_v2 = vadd.f32 %v613_v0, %v288_v55 }
 0x1d7   :  { %644 = vst [vmem:[%s1502_s5 + $0x50] sm:$0xff] %v594_v61  ;;  %662 = vst [vmem:[%s1502_s5 + $0xe0] sm:$0xff] %v612_v62 }
 0x1d8   :  { %645 = vst [vmem:[%s1502_s5 + $0x58] sm:$0xff] %v596_v1  ;;  %663 = vst [vmem:[%s1502_s5 + $0xe8] sm:$0xff] %v614_v2  ;;  %v599_v3 = vpop.f32.mrb[28].mxu0  ;;  %v617_v4 = vpop.f32.mrb[20].mxu1 }
 0x1d9   :  { %v600_v5 = vadd.f32 %v599_v3, %v284_v52  ;;  %v618_v6 = vadd.f32 %v617_v4, %v284_v52  ;;  %v601_v7 = vpop.f32.mrb[29].mxu0  ;;  %v619_v8 = vpop.f32.mrb[21].mxu1 }
 0x1da   :  { %v602_v9 = vadd.f32 %v601_v7, %v288_v55  ;;  %v620_v10 = vadd.f32 %v619_v8, %v288_v55 }
 0x1db   :  { %650 = vst [vmem:[%s1502_s5 + $0x80] sm:$0xff] %v600_v5  ;;  %668 = vst [vmem:[%s1502_s5 + $0x110] sm:$0xff] %v618_v6 }
 0x1dc   :  { %651 = vst [vmem:[%s1502_s5 + $0x88] sm:$0xff] %v602_v9  ;;  %669 = vst [vmem:[%s1502_s5 + $0x118] sm:$0xff] %v620_v10  ;;  %v623_v11 = vpop.f32.mrb[22].mxu1 }
 0x1dd   :  { %v624_v12 = vadd.f32 %v623_v11, %v284_v52  ;;  %v625_v13 = vpop.f32.mrb[23].mxu1 }
 0x1de   :  { %v626_v14 = vadd.f32 %v625_v13, %v288_v55 }
 0x1df   :  { %674 = vst [vmem:[%s1502_s5 + $0x140] sm:$0xff] %v624_v12 }
 0x1e0   :  { %675 = vst [vmem:[%s1502_s5 + $0x148] sm:$0xff] %v626_v14  ;;  %v629_v15 = vpop.f32.mrb[24].mxu1 }
 0x1e1   :  { %v630_v16 = vadd.f32 %v629_v15, %v284_v52  ;;  %v631_v17 = vpop.f32.mrb[25].mxu1 }
 0x1e2   :  { %v632_v18 = vadd.f32 %v631_v17, %v288_v55 }
 0x1e3   :  { %680 = vst [vmem:[%s1502_s5 + $0x170] sm:$0xff] %v630_v16 }
 0x1e4   :  { %681 = vst [vmem:[%s1502_s5 + $0x178] sm:$0xff] %v632_v18 }

</bundles_post_ra>
